<compile_context>
chip_gen: v7x
topology: tpu7x:2x2x1
jax: 0.10.0
libtpu: 0.0.40
codegen_flags: <defaults>
</compile_context>

<pallas_src>
import jax
import jax.numpy as jnp
from jax.experimental import pallas as pl
from jax.experimental.pallas import tpu as pltpu


_MIN_MATERIALIZE_BYTES = 1 << 20   # below this, a copy kernel is pure overhead
_TILE_BUDGET_BYTES = 2 << 20       # ~2 MiB tile: safe on v5e/v6e/v7x defaults
_MAX_LANES = 16384                 # widest lane-dense slab we flatten to


def _select_copy_kernel(x_ref, o_ref):
    # Identity: write the selected tuple element through to the output tile.
    o_ref[...] = x_ref[...]


def _pick_lanes(total):
    """Largest multiple of 128 that divides `total`, capped at _MAX_LANES."""
    cap = min(total, _MAX_LANES)
    lanes = cap - (cap % 128)
    while lanes >= 128:
        if total % lanes == 0:
            return lanes
        lanes -= 128
    return 0


def _pick_block_rows(rows, lanes, itemsize):
    """Rows per tile: <= ~2 MiB, multiple of 8, dividing `rows` if possible."""
    max_rows = max(1, _TILE_BUDGET_BYTES // (lanes * itemsize))
    if rows <= max_rows:
        return rows  # full dim as block shape is always legal
    start = min(max_rows, rows)
    start -= start % 8
    # Prefer an exact divisor (no masked partial trailing block).
    cand = start
    while cand >= 8:
        if rows % cand == 0:
            return cand
        cand -= 8
    # Fallback: accept a partial tail (pl.cdiv grid handles it correctly).
    return max(start, 8)


def _materialize_copy(x):
    """Tiled, lane-dense Pallas identity copy of `x` (new HBM buffer)."""
    total = x.size
    itemsize = jnp.dtype(x.dtype).itemsize

    if total * itemsize < _MIN_MATERIALIZE_BYTES:
        # Kernel launch + pipeline overhead would dwarf the copy itself.
        return x

    lanes = _pick_lanes(total)
    if lanes == 0:
        # TODO(synk): add a padded-copy path for element counts not divisible
        # by 128; returning the original array keeps RNNSelect semantics.
        return x

    rows = total // lanes
    x2 = x.reshape(rows, lanes)  # layout plumbing only, no compute.

    block_rows = _pick_block_rows(rows, lanes, itemsize)
    grid = (pl.cdiv(rows, block_rows),)

    out2 = pl.pallas_call(
        _select_copy_kernel,
        out_shape=jax.ShapeDtypeStruct((rows, lanes), x2.dtype),
        grid=grid,
        in_specs=[pl.BlockSpec((block_rows, lanes), lambda i: (i, 0))],
        out_specs=pl.BlockSpec((block_rows, lanes), lambda i: (i, 0)),
        compiler_params=pltpu.CompilerParams(
            dimension_semantics=("parallel",)),
        # Pure data movement: 0 flops, one read + one write of the tensor.
        cost_estimate=pl.CostEstimate(
            flops=0, transcendentals=0,
            bytes_accessed=2 * total * itemsize),
    )(x2)

    return out2.reshape(x.shape)


def rnn_select(inputs, materialize=False):
    """Pallas equivalent of RNNSelect.forward: returns inputs[0].

    Args:
      inputs: tuple (or list) of jnp arrays.
      materialize: if True, return a freshly materialized copy of inputs[0]
        via a tiled Pallas kernel (large tensors only); default False matches
        PyTorch's return-by-reference semantics at zero cost.
    """
    x = inputs[0]  # tuple selection is plain Python glue, like PyTorch indexing.
    if not materialize:
        return x
    return _materialize_copy(x)


if __name__ == "__main__":
    key = jax.random.PRNGKey(0)
    k0, k1, k2 = jax.random.split(key, 3)

    # 1) Module-faithful small case: (output, hidden) tuple, fast path.
    B, T, H = 2, 8, 32
    rnn_output = jax.random.normal(k0, (B, T, H), dtype=jnp.float32)
    rnn_hidden = jax.random.normal(k1, (B, H), dtype=jnp.float32)
    inputs = (rnn_output, rnn_hidden)

    out = rnn_select(inputs)
    out = jax.block_until_ready(out)
    assert out.shape == rnn_output.shape
    assert out.dtype == rnn_output.dtype
    assert bool(jnp.allclose(out, rnn_output))

    # Small tensors short-circuit the kernel even when materialize=True.
    out_small = jax.block_until_ready(rnn_select(inputs, materialize=True))
    assert bool(jnp.allclose(out_small, rnn_output))

    # 2) Exercise the Pallas copy kernel once on a modest (4 MiB) tensor so the
    #    kernel path compiles and runs on TPU.
    big = jax.random.normal(k2, (16, 128, 512), dtype=jnp.float32)  # 4 MiB
    big_inputs = (big, rnn_hidden)
    out_big = rnn_select(big_inputs, materialize=True)
    out_big = jax.block_until_ready(out_big)
    assert out_big.shape == big.shape
    assert out_big.dtype == big.dtype
    assert bool(jnp.allclose(out_big, big))

    print("KERNEL_OK")
</pallas_src>

<mosaic_0001>
module attributes {stable_mosaic.version = 11 : i64} {
  func.func @_select_copy_kernel(%arg0: i32, %arg1: memref<32x16384xf32, #tpu.memory_space<vmem>>, %arg2: memref<32x16384xf32, #tpu.memory_space<vmem>>) attributes {dimension_semantics = [#tpu.dimension_semantics<parallel>], iteration_bounds = array<i64: 2>, scalar_prefetch = 0 : i64, scratch_operands = 0 : i64, tpu.core_type = #tpu.core_type<tc>, window_params = [{transform_indices = @transform_0, window_bounds = array<i64: 32, 16384>}, {transform_indices = @transform_1, window_bounds = array<i64: 32, 16384>}]} {
    %c0 = arith.constant 0 : index
    %c0_0 = arith.constant 0 : index
    %0 = vector.load %arg1[%c0, %c0_0] : memref<32x16384xf32, #tpu.memory_space<vmem>>, vector<32x16384xf32>
    %c0_1 = arith.constant 0 : index
    %c0_2 = arith.constant 0 : index
    %1 = vector.load %arg2[%c0_1, %c0_2] : memref<32x16384xf32, #tpu.memory_space<vmem>>, vector<32x16384xf32>
    tpu.vector_store %arg2[%c0_1, %c0_2], %0 {strides = array<i32>} : memref<32x16384xf32, #tpu.memory_space<vmem>>, vector<32x16384xf32>,
    return
  }
  func.func @transform_0(%arg0: i32) -> (i32, i32) {
    %c0_i32 = arith.constant 0 : i32
    %c0_i32_0 = arith.constant 0 : i32
    return %arg0, %c0_i32 : i32, i32
  }
  func.func @transform_1(%arg0: i32) -> (i32, i32) {
    %c0_i32 = arith.constant 0 : i32
    %c0_i32_0 = arith.constant 0 : i32
    return %arg0, %c0_i32 : i32, i32
  }
}

</mosaic_0001>

<bundles_post_ra>
// kernel: tpu_custom_call.1
= control target key start
LH: loop header
LB: loop body
LE: loop exit
PB: predicated region body
PF: predicated region fallthrough
CT: control target
= control target key end

     0   :  { %6 = vsyncpa [#allocation3], 0  ;;  %s2625_s0 = inlined_call_operand.hbm [shape: f32[64,16384], index: 0, kind: input, shape index: {}]   ;;  %s2626_s1 = inlined_call_operand.hbm [shape: f32[64,16384], index: 1, kind: output, shape index: {}]  }
   0x1   :  { %8 = vsyncpa [#allocation3 + $0x1], 0 }
   0x2   :  { %9 = vsyncpa [#allocation4], 0 }
   0x3   :  { %11 = vsyncpa [#allocation4 + $0x1], 0  ;;  %s1434_s6 = smov 0   ;;  %s1436_s7 = smov 0  }
   0x4   :  { %s1438_s8 = smov 0   ;;  %s1440_s9 = smov 0  }
   0x5 LB: > { %s1455_s10 = sadd.s32 4294967295, %s1416_s9   ;;  %s1250_s11 = sadd.s32 4294967294, %s1416_s9   ;;  %s1416_s9 = sphi %s1440_s9, %s2639_s9   ;;  %s1412_s8 = sphi %s1438_s8, %s2638_s8   ;;  %s1408_s7 = sphi %s1436_s7, %s2637_s7   ;;  %s1404_s6 = sphi %s1434_s6, %s2636_s6  }
   0x6   : > { %s1459_s12 = sadd.s32 1, %s1416_s9   ;;  %s24_s13 = sadd.s32 1, %s1412_s8 }
   0x7   : > { %s21_s14 = ssub.s32 %s1416_s9, %s1459_s12  ;;  %p31_p0 = scmp.ne.s32.totalorder %s1412_s8, %s1408_s7 }
   0x8   : > { %p22_p1 = scmp.eq.s32.totalorder %s21_s14, 0  ;;  %p32_p2 = scmp.eq.s32.totalorder %s1416_s9, 0 }
   0x9   : > { %p37_p3 = scmp.ne.s32.totalorder %s1408_s7, %s1404_s6  ;;  %p38_p4 = scmp.eq.s32.totalorder %s1455_s10, 0 }
   0xa   : > { %s1471_s15 = scalar_select %p22_p1, %s1412_s8, %s24_s13  }
   0xb   : > { %p1473_p5 = por %p32_p2, %p31_p0  ;;  %p1477_p6 = por %p38_p4, %p37_p3 }
   0xc   : > { %p61_p7 = scmp.eq.s32.totalorder %s1455_s10, 1  ;;  %p67_p8 = scmp.eq.s32.totalorder %s1250_s11, 1 }
   0xd   : > { %p1282_p10 = scmp.lt.s32.totalorder %s1416_s9, 2  ;;  %s87_s20 = sand.u32 1, %s1412_s8  }
   0xe   : > { %p1484_p11 = por %p61_p7, %p31_p0  ;;  %p1488_p12 = por %p67_p8, %p37_p3 }
   0xf   : > { %s1267_s21 = sshll.u32 %s1416_s9, 16  ;;  %s1253_s22 = sshll.u32 %s87_s20, 12 }
  0x10   : > { %s2630_s18 = scalar_select %p1484_p11, 1, 0 }
  0x11   : > { %s2631_s19 = scalar_select %p1488_p12, 1, 0 }
  0x12   : > { %s1497_s25 = scalar_lea.hbm %s2625_s0, %s1267_s21  ;;  %s91_s26 = scalar_lea.vmem [#allocation2], %s1253_s22 }
  0x13   : > { %s99_s27 = sshll.u32 %s91_s26, 4  ;;  %p1501_p13 = pnand %p1282_p10, %p1473_p5  ;;  %s1505_s27 = int_to_ptr.vmem [resolvable:$true] %s99_s27 }
  0x14   : > { %s1507_s29 = scalar_lea.sflag [#allocation3], %s87_s20  ;;  %s1320_s30 = scalar_lea.hbm %s1497_s25, 65536 }
  0x15   : > { %p1321_p0 = scmp.ne.s32.totalorder %s1497_s25, %s1320_s30  ;;  %p1322_p1 = pneg %p1501_p13 }
  0x16   : > { %s1325_s4 = scalar_lea.hbm %s2625_s0, 131072  ;;  %p1326_p4 = scmp.lt.u32.totalorder %s1497_s25, %s2625_s0 }
  0x17   : > { %p1323_p2 = pnand %p1322_p1, %p1321_p0  ;;  %p1327_p5 = scmp.lt.u32.totalorder %s1325_s4, %s1320_s30 }
  0x18   : > { %p1329_p8 = scmp.lt.u32.totalorder %s1320_s30, %s1497_s25 }
  0x19   : > { %p1324_p3 = pneg %p1323_p2  ;;  %p1328_p7 = por %p1327_p5, %p1326_p4 }
  0x1b   : > { %p1330_p10 = por %p1329_p8, %p1328_p7 }
  0x1d   : > { %p1331_p9 = pnand %p1330_p10, %p1324_p3 }
  0x1f   : > { %1334 = shalt.err (!%p1331_p9)
}
  0x20   : > { %s1335_s13 = scalar_lea.vmem %s1505_s27, 65536  ;;  %s1418_s14 = smov [#allocation2]  }
  0x21   : > { %p1336_p0 = scmp.ne.s32.totalorder %s1505_s27, %s1335_s13  ;;  %s1340_s16 = sshll.u32 %s1418_s14, 4  ;;  %s1341_s16 = int_to_ptr.vmem [resolvable:$false] %s1340_s16 }
  0x22   : > { %s1342_s20 = scalar_lea.vmem %s1341_s16, 131072  ;;  %p1343_p11 = scmp.lt.s32.totalorder %s1505_s27, %s1341_s16 }
  0x23   : > { %p1338_p2 = pnand %p1336_p0, %p1322_p1  ;;  %p1344_p4 = scmp.lt.s32.totalorder %s1342_s20, %s1335_s13 }
  0x25   : > { %p1339_p12 = pneg %p1338_p2  ;;  %p1345_p5 = por %p1344_p4, %p1343_p11 }
  0x27   : > { %p1346_p7 = pnand %p1345_p5, %p1339_p12 }
  0x29   : > { %1349 = shalt.err (!%p1346_p7)
}
  0x2a   : > { %s1419_s21 = smov 16384   ;;  %s1420_s22 = smov 1024  }
  0x2b   : > { %1277 = dma.hbm_to_vmem [thread:$0]  (!%p1501_p13), %s1497_s25, 65536, %s1505_s27, %s1507_s29, %s1419_s21, %s1419_s21, %s1420_s22  }
  0x2c   : > { %p1257_p9 = scmp.ge.s32.totalorder %s1416_s9, 1  ;;  %p107_p1 = scmp.lt.s32.totalorder %s1416_s9, 3 }
  0x2e   : > { %p108_p3 = pnand %p1257_p9, %p107_p1 }
  0x2f   : > { %s1538_s23 = sand.u32 (!%p108_p3), 1, %s1408_s7  }
  0x30   : > { %111 = sbr.rel (%p108_p3) target bundleno = 327 (0x147), region = 24  ;;  %s1258_s24 = sshll.u32 (!%p108_p3), %s1538_s23, 12 }
  0x31   : > { %s114_s26 = scalar_lea.sflag (!%p108_p3), [#allocation3], %s1538_s23  ;;  %s1542_s30 = scalar_lea.vmem (!%p108_p3), [#allocation2], %s1258_s24 }
  0x37   : > { %1395 = dma.done.wait (%p1477_p6), %s114_s26, 65536  }
  0x38   : > { %1397 = vsyncadd (%p1477_p6), %s114_s26, 4294901760  ;;  %v138_v0 = vld [vmem:[%s1542_s30] sm:$0xff]  ;;  %v139_v1 = vld [vmem:[%s1542_s30 + $0x8] sm:$0xff]  ;;  %s1551_s25 = scalar_lea.vmem [#allocation5], %s1258_s24  ;;  %s1269_s17 = sshll.u32 %s1455_s10, 16 }
  0x39   : > { %v140_v2 = vld [vmem:[%s1542_s30 + $0x10] sm:$0xff]  ;;  %650 = vst [vmem:[%s1551_s25] sm:$0xff] %v138_v0  ;;  %651 = vst [vmem:[%s1551_s25 + $0x8] sm:$0xff] %v139_v1  ;;  %v141_v3 = vld [vmem:[%s1542_s30 + $0x18] sm:$0xff]  ;;  %s1177_s27 = sshll.u32 %s1551_s25, 4  ;;  %s2566_s29 = scalar_lea.hbm %s2626_s1, %s1269_s17  ;;  %s2568_s27 = int_to_ptr.vmem [resolvable:$true] %s1177_s27 }
  0x3a   : > { %652 = vst [vmem:[%s1551_s25 + $0x10] sm:$0xff] %v140_v2  ;;  %v142_v4 = vld [vmem:[%s1542_s30 + $0x20] sm:$0xff]  ;;  %v143_v5 = vld [vmem:[%s1542_s30 + $0x28] sm:$0xff]  ;;  %653 = vst [vmem:[%s1551_s25 + $0x18] sm:$0xff] %v141_v3  ;;  %s1163_s2 = scalar_lea.sflag [#allocation4], %s1538_s23  ;;  %s1350_s3 = scalar_lea.vmem %s2568_s27, 65536 }
  0x3b   : > { %654 = vst [vmem:[%s1551_s25 + $0x20] sm:$0xff] %v142_v4  ;;  %655 = vst [vmem:[%s1551_s25 + $0x28] sm:$0xff] %v143_v5  ;;  %v144_v6 = vld [vmem:[%s1542_s30 + $0x30] sm:$0xff]  ;;  %v145_v7 = vld [vmem:[%s1542_s30 + $0x38] sm:$0xff]  ;;  %p1351_p6 = scmp.ne.s32.totalorder %s2568_s27, %s1350_s3  ;;  %p2633_p11 = scmp.ne.s32.totalorder %s2630_s18, 0 }
  0x3c   : > { %v146_v8 = vld [vmem:[%s1542_s30 + $0x40] sm:$0xff]  ;;  %656 = vst [vmem:[%s1551_s25 + $0x30] sm:$0xff] %v144_v6  ;;  %657 = vst [vmem:[%s1551_s25 + $0x38] sm:$0xff] %v145_v7  ;;  %v147_v9 = vld [vmem:[%s1542_s30 + $0x48] sm:$0xff]  ;;  %s1421_s4 = smov [#allocation5]  }
  0x3d   : > { %658 = vst [vmem:[%s1551_s25 + $0x40] sm:$0xff] %v146_v8  ;;  %v148_v10 = vld [vmem:[%s1542_s30 + $0x50] sm:$0xff]  ;;  %v149_v11 = vld [vmem:[%s1542_s30 + $0x58] sm:$0xff]  ;;  %659 = vst [vmem:[%s1551_s25 + $0x48] sm:$0xff] %v147_v9  ;;  %p1352_p12 = pnand %p1351_p6, %p2633_p11  ;;  %s1354_s5 = sshll.u32 %s1421_s4, 4  ;;  %s1355_s5 = int_to_ptr.vmem [resolvable:$false] %s1354_s5 }
  0x3e   : > { %660 = vst [vmem:[%s1551_s25 + $0x50] sm:$0xff] %v148_v10  ;;  %661 = vst [vmem:[%s1551_s25 + $0x58] sm:$0xff] %v149_v11  ;;  %v150_v12 = vld [vmem:[%s1542_s30 + $0x60] sm:$0xff]  ;;  %v151_v13 = vld [vmem:[%s1542_s30 + $0x68] sm:$0xff]  ;;  %s1356_s11 = scalar_lea.vmem %s1355_s5, 131072  ;;  %p1357_p8 = scmp.lt.s32.totalorder %s2568_s27, %s1355_s5 }
  0x3f   : > { %v152_v14 = vld [vmem:[%s1542_s30 + $0x70] sm:$0xff]  ;;  %662 = vst [vmem:[%s1551_s25 + $0x60] sm:$0xff] %v150_v12  ;;  %663 = vst [vmem:[%s1551_s25 + $0x68] sm:$0xff] %v151_v13  ;;  %v153_v15 = vld [vmem:[%s1542_s30 + $0x78] sm:$0xff]  ;;  %p1353_p13 = pneg %p1352_p12  ;;  %p1358_p10 = scmp.lt.s32.totalorder %s1356_s11, %s1350_s3 }
  0x40   : > { %664 = vst [vmem:[%s1551_s25 + $0x70] sm:$0xff] %v152_v14  ;;  %v154_v16 = vld [vmem:[%s1542_s30 + $0x80] sm:$0xff]  ;;  %v155_v17 = vld [vmem:[%s1542_s30 + $0x88] sm:$0xff]  ;;  %665 = vst [vmem:[%s1551_s25 + $0x78] sm:$0xff] %v153_v15 }
  0x41   : > { %666 = vst [vmem:[%s1551_s25 + $0x80] sm:$0xff] %v154_v16  ;;  %667 = vst [vmem:[%s1551_s25 + $0x88] sm:$0xff] %v155_v17  ;;  %v156_v18 = vld [vmem:[%s1542_s30 + $0x90] sm:$0xff]  ;;  %v157_v19 = vld [vmem:[%s1542_s30 + $0x98] sm:$0xff]  ;;  %p1359_p0 = por %p1358_p10, %p1357_p8 }
  0x42   : > { %v158_v20 = vld [vmem:[%s1542_s30 + $0xa0] sm:$0xff]  ;;  %668 = vst [vmem:[%s1551_s25 + $0x90] sm:$0xff] %v156_v18  ;;  %669 = vst [vmem:[%s1551_s25 + $0x98] sm:$0xff] %v157_v19  ;;  %v159_v21 = vld [vmem:[%s1542_s30 + $0xa8] sm:$0xff] }
  0x43   : > { %670 = vst [vmem:[%s1551_s25 + $0xa0] sm:$0xff] %v158_v20  ;;  %v160_v22 = vld [vmem:[%s1542_s30 + $0xb0] sm:$0xff]  ;;  %v161_v23 = vld [vmem:[%s1542_s30 + $0xb8] sm:$0xff]  ;;  %671 = vst [vmem:[%s1551_s25 + $0xa8] sm:$0xff] %v159_v21  ;;  %p1360_p2 = pnand %p1359_p0, %p1353_p13 }
  0x44   : > { %672 = vst [vmem:[%s1551_s25 + $0xb0] sm:$0xff] %v160_v22  ;;  %673 = vst [vmem:[%s1551_s25 + $0xb8] sm:$0xff] %v161_v23  ;;  %v162_v24 = vld [vmem:[%s1542_s30 + $0xc0] sm:$0xff]  ;;  %v163_v25 = vld [vmem:[%s1542_s30 + $0xc8] sm:$0xff] }
  0x45   : > { %v164_v26 = vld [vmem:[%s1542_s30 + $0xd0] sm:$0xff]  ;;  %674 = vst [vmem:[%s1551_s25 + $0xc0] sm:$0xff] %v162_v24  ;;  %675 = vst [vmem:[%s1551_s25 + $0xc8] sm:$0xff] %v163_v25  ;;  %v165_v27 = vld [vmem:[%s1542_s30 + $0xd8] sm:$0xff] }
  0x46   : > { %676 = vst [vmem:[%s1551_s25 + $0xd0] sm:$0xff] %v164_v26  ;;  %v166_v28 = vld [vmem:[%s1542_s30 + $0xe0] sm:$0xff]  ;;  %v167_v29 = vld [vmem:[%s1542_s30 + $0xe8] sm:$0xff]  ;;  %677 = vst [vmem:[%s1551_s25 + $0xd8] sm:$0xff] %v165_v27 }
  0x47   : > { %678 = vst [vmem:[%s1551_s25 + $0xe0] sm:$0xff] %v166_v28  ;;  %679 = vst [vmem:[%s1551_s25 + $0xe8] sm:$0xff] %v167_v29  ;;  %v168_v30 = vld [vmem:[%s1542_s30 + $0xf0] sm:$0xff]  ;;  %v169_v31 = vld [vmem:[%s1542_s30 + $0xf8] sm:$0xff] }
  0x48   : > { %v170_v32 = vld [vmem:[%s1542_s30 + $0x100] sm:$0xff]  ;;  %680 = vst [vmem:[%s1551_s25 + $0xf0] sm:$0xff] %v168_v30  ;;  %681 = vst [vmem:[%s1551_s25 + $0xf8] sm:$0xff] %v169_v31  ;;  %v171_v33 = vld [vmem:[%s1542_s30 + $0x108] sm:$0xff] }
  0x49   : > { %682 = vst [vmem:[%s1551_s25 + $0x100] sm:$0xff] %v170_v32  ;;  %v172_v34 = vld [vmem:[%s1542_s30 + $0x110] sm:$0xff]  ;;  %v173_v35 = vld [vmem:[%s1542_s30 + $0x118] sm:$0xff]  ;;  %683 = vst [vmem:[%s1551_s25 + $0x108] sm:$0xff] %v171_v33 }
  0x4a   : > { %684 = vst [vmem:[%s1551_s25 + $0x110] sm:$0xff] %v172_v34  ;;  %685 = vst [vmem:[%s1551_s25 + $0x118] sm:$0xff] %v173_v35  ;;  %v174_v36 = vld [vmem:[%s1542_s30 + $0x120] sm:$0xff]  ;;  %v175_v37 = vld [vmem:[%s1542_s30 + $0x128] sm:$0xff] }
  0x4b   : > { %v176_v38 = vld [vmem:[%s1542_s30 + $0x130] sm:$0xff]  ;;  %686 = vst [vmem:[%s1551_s25 + $0x120] sm:$0xff] %v174_v36  ;;  %687 = vst [vmem:[%s1551_s25 + $0x128] sm:$0xff] %v175_v37  ;;  %v177_v39 = vld [vmem:[%s1542_s30 + $0x138] sm:$0xff] }
  0x4c   : > { %688 = vst [vmem:[%s1551_s25 + $0x130] sm:$0xff] %v176_v38  ;;  %v178_v40 = vld [vmem:[%s1542_s30 + $0x140] sm:$0xff]  ;;  %v179_v41 = vld [vmem:[%s1542_s30 + $0x148] sm:$0xff]  ;;  %689 = vst [vmem:[%s1551_s25 + $0x138] sm:$0xff] %v177_v39 }
  0x4d   : > { %690 = vst [vmem:[%s1551_s25 + $0x140] sm:$0xff] %v178_v40  ;;  %691 = vst [vmem:[%s1551_s25 + $0x148] sm:$0xff] %v179_v41  ;;  %v180_v42 = vld [vmem:[%s1542_s30 + $0x150] sm:$0xff]  ;;  %v181_v43 = vld [vmem:[%s1542_s30 + $0x158] sm:$0xff] }
  0x4e   : > { %v182_v44 = vld [vmem:[%s1542_s30 + $0x160] sm:$0xff]  ;;  %692 = vst [vmem:[%s1551_s25 + $0x150] sm:$0xff] %v180_v42  ;;  %693 = vst [vmem:[%s1551_s25 + $0x158] sm:$0xff] %v181_v43  ;;  %v183_v45 = vld [vmem:[%s1542_s30 + $0x168] sm:$0xff] }
  0x4f   : > { %694 = vst [vmem:[%s1551_s25 + $0x160] sm:$0xff] %v182_v44  ;;  %v184_v46 = vld [vmem:[%s1542_s30 + $0x170] sm:$0xff]  ;;  %v185_v47 = vld [vmem:[%s1542_s30 + $0x178] sm:$0xff]  ;;  %695 = vst [vmem:[%s1551_s25 + $0x168] sm:$0xff] %v183_v45 }
  0x50   : > { %696 = vst [vmem:[%s1551_s25 + $0x170] sm:$0xff] %v184_v46  ;;  %697 = vst [vmem:[%s1551_s25 + $0x178] sm:$0xff] %v185_v47  ;;  %v186_v48 = vld [vmem:[%s1542_s30 + $0x180] sm:$0xff]  ;;  %v187_v49 = vld [vmem:[%s1542_s30 + $0x188] sm:$0xff] }
  0x51   : > { %v188_v50 = vld [vmem:[%s1542_s30 + $0x190] sm:$0xff]  ;;  %698 = vst [vmem:[%s1551_s25 + $0x180] sm:$0xff] %v186_v48  ;;  %699 = vst [vmem:[%s1551_s25 + $0x188] sm:$0xff] %v187_v49  ;;  %v189_v51 = vld [vmem:[%s1542_s30 + $0x198] sm:$0xff] }
  0x52   : > { %700 = vst [vmem:[%s1551_s25 + $0x190] sm:$0xff] %v188_v50  ;;  %v190_v52 = vld [vmem:[%s1542_s30 + $0x1a0] sm:$0xff]  ;;  %v191_v53 = vld [vmem:[%s1542_s30 + $0x1a8] sm:$0xff]  ;;  %701 = vst [vmem:[%s1551_s25 + $0x198] sm:$0xff] %v189_v51 }
  0x53   : > { %702 = vst [vmem:[%s1551_s25 + $0x1a0] sm:$0xff] %v190_v52  ;;  %703 = vst [vmem:[%s1551_s25 + $0x1a8] sm:$0xff] %v191_v53  ;;  %v192_v54 = vld [vmem:[%s1542_s30 + $0x1b0] sm:$0xff]  ;;  %v193_v55 = vld [vmem:[%s1542_s30 + $0x1b8] sm:$0xff] }
  0x54   : > { %v194_v56 = vld [vmem:[%s1542_s30 + $0x1c0] sm:$0xff]  ;;  %704 = vst [vmem:[%s1551_s25 + $0x1b0] sm:$0xff] %v192_v54  ;;  %705 = vst [vmem:[%s1551_s25 + $0x1b8] sm:$0xff] %v193_v55  ;;  %v195_v57 = vld [vmem:[%s1542_s30 + $0x1c8] sm:$0xff] }
  0x55   : > { %706 = vst [vmem:[%s1551_s25 + $0x1c0] sm:$0xff] %v194_v56  ;;  %v196_v58 = vld [vmem:[%s1542_s30 + $0x1d0] sm:$0xff]  ;;  %v197_v59 = vld [vmem:[%s1542_s30 + $0x1d8] sm:$0xff]  ;;  %707 = vst [vmem:[%s1551_s25 + $0x1c8] sm:$0xff] %v195_v57 }
  0x56   : > { %708 = vst [vmem:[%s1551_s25 + $0x1d0] sm:$0xff] %v196_v58  ;;  %709 = vst [vmem:[%s1551_s25 + $0x1d8] sm:$0xff] %v197_v59  ;;  %v198_v60 = vld [vmem:[%s1542_s30 + $0x1e0] sm:$0xff]  ;;  %v199_v61 = vld [vmem:[%s1542_s30 + $0x1e8] sm:$0xff] }
  0x57   : > { %v200_v62 = vld [vmem:[%s1542_s30 + $0x1f0] sm:$0xff]  ;;  %710 = vst [vmem:[%s1551_s25 + $0x1e0] sm:$0xff] %v198_v60  ;;  %711 = vst [vmem:[%s1551_s25 + $0x1e8] sm:$0xff] %v199_v61  ;;  %v201_v63 = vld [vmem:[%s1542_s30 + $0x1f8] sm:$0xff] }
  0x58   : > { %712 = vst [vmem:[%s1551_s25 + $0x1f0] sm:$0xff] %v200_v62  ;;  %v202_v0 = vld [vmem:[%s1542_s30 + $0x200] sm:$0xff]  ;;  %v203_v1 = vld [vmem:[%s1542_s30 + $0x208] sm:$0xff]  ;;  %713 = vst [vmem:[%s1551_s25 + $0x1f8] sm:$0xff] %v201_v63 }
  0x59   : > { %714 = vst [vmem:[%s1551_s25 + $0x200] sm:$0xff] %v202_v0  ;;  %715 = vst [vmem:[%s1551_s25 + $0x208] sm:$0xff] %v203_v1  ;;  %v204_v2 = vld [vmem:[%s1542_s30 + $0x210] sm:$0xff]  ;;  %v205_v3 = vld [vmem:[%s1542_s30 + $0x218] sm:$0xff] }
  0x5a   : > { %v206_v4 = vld [vmem:[%s1542_s30 + $0x220] sm:$0xff]  ;;  %716 = vst [vmem:[%s1551_s25 + $0x210] sm:$0xff] %v204_v2  ;;  %717 = vst [vmem:[%s1551_s25 + $0x218] sm:$0xff] %v205_v3  ;;  %v207_v5 = vld [vmem:[%s1542_s30 + $0x228] sm:$0xff] }
  0x5b   : > { %718 = vst [vmem:[%s1551_s25 + $0x220] sm:$0xff] %v206_v4  ;;  %v208_v6 = vld [vmem:[%s1542_s30 + $0x230] sm:$0xff]  ;;  %v209_v7 = vld [vmem:[%s1542_s30 + $0x238] sm:$0xff]  ;;  %719 = vst [vmem:[%s1551_s25 + $0x228] sm:$0xff] %v207_v5 }
  0x5c   : > { %720 = vst [vmem:[%s1551_s25 + $0x230] sm:$0xff] %v208_v6  ;;  %721 = vst [vmem:[%s1551_s25 + $0x238] sm:$0xff] %v209_v7  ;;  %v210_v8 = vld [vmem:[%s1542_s30 + $0x240] sm:$0xff]  ;;  %v211_v9 = vld [vmem:[%s1542_s30 + $0x248] sm:$0xff] }
  0x5d   : > { %v212_v10 = vld [vmem:[%s1542_s30 + $0x250] sm:$0xff]  ;;  %722 = vst [vmem:[%s1551_s25 + $0x240] sm:$0xff] %v210_v8  ;;  %723 = vst [vmem:[%s1551_s25 + $0x248] sm:$0xff] %v211_v9  ;;  %v213_v11 = vld [vmem:[%s1542_s30 + $0x258] sm:$0xff] }
  0x5e   : > { %724 = vst [vmem:[%s1551_s25 + $0x250] sm:$0xff] %v212_v10  ;;  %v214_v12 = vld [vmem:[%s1542_s30 + $0x260] sm:$0xff]  ;;  %v215_v13 = vld [vmem:[%s1542_s30 + $0x268] sm:$0xff]  ;;  %725 = vst [vmem:[%s1551_s25 + $0x258] sm:$0xff] %v213_v11 }
  0x5f   : > { %726 = vst [vmem:[%s1551_s25 + $0x260] sm:$0xff] %v214_v12  ;;  %727 = vst [vmem:[%s1551_s25 + $0x268] sm:$0xff] %v215_v13  ;;  %v216_v14 = vld [vmem:[%s1542_s30 + $0x270] sm:$0xff]  ;;  %v217_v15 = vld [vmem:[%s1542_s30 + $0x278] sm:$0xff] }
  0x60   : > { %v218_v16 = vld [vmem:[%s1542_s30 + $0x280] sm:$0xff]  ;;  %728 = vst [vmem:[%s1551_s25 + $0x270] sm:$0xff] %v216_v14  ;;  %729 = vst [vmem:[%s1551_s25 + $0x278] sm:$0xff] %v217_v15  ;;  %v219_v17 = vld [vmem:[%s1542_s30 + $0x288] sm:$0xff] }
  0x61   : > { %730 = vst [vmem:[%s1551_s25 + $0x280] sm:$0xff] %v218_v16  ;;  %v220_v18 = vld [vmem:[%s1542_s30 + $0x290] sm:$0xff]  ;;  %v221_v19 = vld [vmem:[%s1542_s30 + $0x298] sm:$0xff]  ;;  %731 = vst [vmem:[%s1551_s25 + $0x288] sm:$0xff] %v219_v17 }
  0x62   : > { %732 = vst [vmem:[%s1551_s25 + $0x290] sm:$0xff] %v220_v18  ;;  %733 = vst [vmem:[%s1551_s25 + $0x298] sm:$0xff] %v221_v19  ;;  %v222_v20 = vld [vmem:[%s1542_s30 + $0x2a0] sm:$0xff]  ;;  %v223_v21 = vld [vmem:[%s1542_s30 + $0x2a8] sm:$0xff] }
  0x63   : > { %v224_v22 = vld [vmem:[%s1542_s30 + $0x2b0] sm:$0xff]  ;;  %734 = vst [vmem:[%s1551_s25 + $0x2a0] sm:$0xff] %v222_v20  ;;  %735 = vst [vmem:[%s1551_s25 + $0x2a8] sm:$0xff] %v223_v21  ;;  %v225_v23 = vld [vmem:[%s1542_s30 + $0x2b8] sm:$0xff] }
  0x64   : > { %736 = vst [vmem:[%s1551_s25 + $0x2b0] sm:$0xff] %v224_v22  ;;  %v226_v24 = vld [vmem:[%s1542_s30 + $0x2c0] sm:$0xff]  ;;  %v227_v25 = vld [vmem:[%s1542_s30 + $0x2c8] sm:$0xff]  ;;  %737 = vst [vmem:[%s1551_s25 + $0x2b8] sm:$0xff] %v225_v23 }
  0x65   : > { %738 = vst [vmem:[%s1551_s25 + $0x2c0] sm:$0xff] %v226_v24  ;;  %739 = vst [vmem:[%s1551_s25 + $0x2c8] sm:$0xff] %v227_v25  ;;  %v228_v26 = vld [vmem:[%s1542_s30 + $0x2d0] sm:$0xff]  ;;  %v229_v27 = vld [vmem:[%s1542_s30 + $0x2d8] sm:$0xff] }
  0x66   : > { %v230_v28 = vld [vmem:[%s1542_s30 + $0x2e0] sm:$0xff]  ;;  %740 = vst [vmem:[%s1551_s25 + $0x2d0] sm:$0xff] %v228_v26  ;;  %741 = vst [vmem:[%s1551_s25 + $0x2d8] sm:$0xff] %v229_v27  ;;  %v231_v29 = vld [vmem:[%s1542_s30 + $0x2e8] sm:$0xff] }
  0x67   : > { %742 = vst [vmem:[%s1551_s25 + $0x2e0] sm:$0xff] %v230_v28  ;;  %v232_v30 = vld [vmem:[%s1542_s30 + $0x2f0] sm:$0xff]  ;;  %v233_v31 = vld [vmem:[%s1542_s30 + $0x2f8] sm:$0xff]  ;;  %743 = vst [vmem:[%s1551_s25 + $0x2e8] sm:$0xff] %v231_v29 }
  0x68   : > { %744 = vst [vmem:[%s1551_s25 + $0x2f0] sm:$0xff] %v232_v30  ;;  %745 = vst [vmem:[%s1551_s25 + $0x2f8] sm:$0xff] %v233_v31  ;;  %v234_v32 = vld [vmem:[%s1542_s30 + $0x300] sm:$0xff]  ;;  %v235_v33 = vld [vmem:[%s1542_s30 + $0x308] sm:$0xff] }
  0x69   : > { %v236_v34 = vld [vmem:[%s1542_s30 + $0x310] sm:$0xff]  ;;  %746 = vst [vmem:[%s1551_s25 + $0x300] sm:$0xff] %v234_v32  ;;  %747 = vst [vmem:[%s1551_s25 + $0x308] sm:$0xff] %v235_v33  ;;  %v237_v35 = vld [vmem:[%s1542_s30 + $0x318] sm:$0xff] }
  0x6a   : > { %748 = vst [vmem:[%s1551_s25 + $0x310] sm:$0xff] %v236_v34  ;;  %v238_v36 = vld [vmem:[%s1542_s30 + $0x320] sm:$0xff]  ;;  %v239_v37 = vld [vmem:[%s1542_s30 + $0x328] sm:$0xff]  ;;  %749 = vst [vmem:[%s1551_s25 + $0x318] sm:$0xff] %v237_v35 }
  0x6b   : > { %750 = vst [vmem:[%s1551_s25 + $0x320] sm:$0xff] %v238_v36  ;;  %751 = vst [vmem:[%s1551_s25 + $0x328] sm:$0xff] %v239_v37  ;;  %v240_v38 = vld [vmem:[%s1542_s30 + $0x330] sm:$0xff]  ;;  %v241_v39 = vld [vmem:[%s1542_s30 + $0x338] sm:$0xff] }
  0x6c   : > { %v242_v40 = vld [vmem:[%s1542_s30 + $0x340] sm:$0xff]  ;;  %752 = vst [vmem:[%s1551_s25 + $0x330] sm:$0xff] %v240_v38  ;;  %753 = vst [vmem:[%s1551_s25 + $0x338] sm:$0xff] %v241_v39  ;;  %v243_v41 = vld [vmem:[%s1542_s30 + $0x348] sm:$0xff] }
  0x6d   : > { %754 = vst [vmem:[%s1551_s25 + $0x340] sm:$0xff] %v242_v40  ;;  %v244_v42 = vld [vmem:[%s1542_s30 + $0x350] sm:$0xff]  ;;  %v245_v43 = vld [vmem:[%s1542_s30 + $0x358] sm:$0xff]  ;;  %755 = vst [vmem:[%s1551_s25 + $0x348] sm:$0xff] %v243_v41 }
  0x6e   : > { %756 = vst [vmem:[%s1551_s25 + $0x350] sm:$0xff] %v244_v42  ;;  %757 = vst [vmem:[%s1551_s25 + $0x358] sm:$0xff] %v245_v43  ;;  %v246_v44 = vld [vmem:[%s1542_s30 + $0x360] sm:$0xff]  ;;  %v247_v45 = vld [vmem:[%s1542_s30 + $0x368] sm:$0xff] }
  0x6f   : > { %v248_v46 = vld [vmem:[%s1542_s30 + $0x370] sm:$0xff]  ;;  %758 = vst [vmem:[%s1551_s25 + $0x360] sm:$0xff] %v246_v44  ;;  %759 = vst [vmem:[%s1551_s25 + $0x368] sm:$0xff] %v247_v45  ;;  %v249_v47 = vld [vmem:[%s1542_s30 + $0x378] sm:$0xff] }
  0x70   : > { %760 = vst [vmem:[%s1551_s25 + $0x370] sm:$0xff] %v248_v46  ;;  %v250_v48 = vld [vmem:[%s1542_s30 + $0x380] sm:$0xff]  ;;  %v251_v49 = vld [vmem:[%s1542_s30 + $0x388] sm:$0xff]  ;;  %761 = vst [vmem:[%s1551_s25 + $0x378] sm:$0xff] %v249_v47 }
  0x71   : > { %762 = vst [vmem:[%s1551_s25 + $0x380] sm:$0xff] %v250_v48  ;;  %763 = vst [vmem:[%s1551_s25 + $0x388] sm:$0xff] %v251_v49  ;;  %v252_v50 = vld [vmem:[%s1542_s30 + $0x390] sm:$0xff]  ;;  %v253_v51 = vld [vmem:[%s1542_s30 + $0x398] sm:$0xff] }
  0x72   : > { %v254_v52 = vld [vmem:[%s1542_s30 + $0x3a0] sm:$0xff]  ;;  %764 = vst [vmem:[%s1551_s25 + $0x390] sm:$0xff] %v252_v50  ;;  %765 = vst [vmem:[%s1551_s25 + $0x398] sm:$0xff] %v253_v51  ;;  %v255_v53 = vld [vmem:[%s1542_s30 + $0x3a8] sm:$0xff] }
  0x73   : > { %766 = vst [vmem:[%s1551_s25 + $0x3a0] sm:$0xff] %v254_v52  ;;  %v256_v54 = vld [vmem:[%s1542_s30 + $0x3b0] sm:$0xff]  ;;  %v257_v55 = vld [vmem:[%s1542_s30 + $0x3b8] sm:$0xff]  ;;  %767 = vst [vmem:[%s1551_s25 + $0x3a8] sm:$0xff] %v255_v53 }
  0x74   : > { %768 = vst [vmem:[%s1551_s25 + $0x3b0] sm:$0xff] %v256_v54  ;;  %769 = vst [vmem:[%s1551_s25 + $0x3b8] sm:$0xff] %v257_v55  ;;  %v258_v56 = vld [vmem:[%s1542_s30 + $0x3c0] sm:$0xff]  ;;  %v259_v57 = vld [vmem:[%s1542_s30 + $0x3c8] sm:$0xff] }
  0x75   : > { %v260_v58 = vld [vmem:[%s1542_s30 + $0x3d0] sm:$0xff]  ;;  %770 = vst [vmem:[%s1551_s25 + $0x3c0] sm:$0xff] %v258_v56  ;;  %771 = vst [vmem:[%s1551_s25 + $0x3c8] sm:$0xff] %v259_v57  ;;  %v261_v59 = vld [vmem:[%s1542_s30 + $0x3d8] sm:$0xff] }
  0x76   : > { %772 = vst [vmem:[%s1551_s25 + $0x3d0] sm:$0xff] %v260_v58  ;;  %v262_v60 = vld [vmem:[%s1542_s30 + $0x3e0] sm:$0xff]  ;;  %v263_v61 = vld [vmem:[%s1542_s30 + $0x3e8] sm:$0xff]  ;;  %773 = vst [vmem:[%s1551_s25 + $0x3d8] sm:$0xff] %v261_v59 }
  0x77   : > { %774 = vst [vmem:[%s1551_s25 + $0x3e0] sm:$0xff] %v262_v60  ;;  %775 = vst [vmem:[%s1551_s25 + $0x3e8] sm:$0xff] %v263_v61  ;;  %v264_v62 = vld [vmem:[%s1542_s30 + $0x3f0] sm:$0xff]  ;;  %v265_v63 = vld [vmem:[%s1542_s30 + $0x3f8] sm:$0xff] }
  0x78   : > { %v266_v0 = vld [vmem:[%s1542_s30 + $0x400] sm:$0xff]  ;;  %776 = vst [vmem:[%s1551_s25 + $0x3f0] sm:$0xff] %v264_v62  ;;  %777 = vst [vmem:[%s1551_s25 + $0x3f8] sm:$0xff] %v265_v63  ;;  %v267_v1 = vld [vmem:[%s1542_s30 + $0x408] sm:$0xff] }
  0x79   : > { %778 = vst [vmem:[%s1551_s25 + $0x400] sm:$0xff] %v266_v0  ;;  %v268_v2 = vld [vmem:[%s1542_s30 + $0x410] sm:$0xff]  ;;  %v269_v3 = vld [vmem:[%s1542_s30 + $0x418] sm:$0xff]  ;;  %779 = vst [vmem:[%s1551_s25 + $0x408] sm:$0xff] %v267_v1 }
  0x7a   : > { %780 = vst [vmem:[%s1551_s25 + $0x410] sm:$0xff] %v268_v2  ;;  %781 = vst [vmem:[%s1551_s25 + $0x418] sm:$0xff] %v269_v3  ;;  %v270_v4 = vld [vmem:[%s1542_s30 + $0x420] sm:$0xff]  ;;  %v271_v5 = vld [vmem:[%s1542_s30 + $0x428] sm:$0xff] }
  0x7b   : > { %v272_v6 = vld [vmem:[%s1542_s30 + $0x430] sm:$0xff]  ;;  %782 = vst [vmem:[%s1551_s25 + $0x420] sm:$0xff] %v270_v4  ;;  %783 = vst [vmem:[%s1551_s25 + $0x428] sm:$0xff] %v271_v5  ;;  %v273_v7 = vld [vmem:[%s1542_s30 + $0x438] sm:$0xff] }
  0x7c   : > { %784 = vst [vmem:[%s1551_s25 + $0x430] sm:$0xff] %v272_v6  ;;  %v274_v8 = vld [vmem:[%s1542_s30 + $0x440] sm:$0xff]  ;;  %v275_v9 = vld [vmem:[%s1542_s30 + $0x448] sm:$0xff]  ;;  %785 = vst [vmem:[%s1551_s25 + $0x438] sm:$0xff] %v273_v7 }
  0x7d   : > { %786 = vst [vmem:[%s1551_s25 + $0x440] sm:$0xff] %v274_v8  ;;  %787 = vst [vmem:[%s1551_s25 + $0x448] sm:$0xff] %v275_v9  ;;  %v276_v10 = vld [vmem:[%s1542_s30 + $0x450] sm:$0xff]  ;;  %v277_v11 = vld [vmem:[%s1542_s30 + $0x458] sm:$0xff] }
  0x7e   : > { %v278_v12 = vld [vmem:[%s1542_s30 + $0x460] sm:$0xff]  ;;  %788 = vst [vmem:[%s1551_s25 + $0x450] sm:$0xff] %v276_v10  ;;  %789 = vst [vmem:[%s1551_s25 + $0x458] sm:$0xff] %v277_v11  ;;  %v279_v13 = vld [vmem:[%s1542_s30 + $0x468] sm:$0xff] }
  0x7f   : > { %790 = vst [vmem:[%s1551_s25 + $0x460] sm:$0xff] %v278_v12  ;;  %v280_v14 = vld [vmem:[%s1542_s30 + $0x470] sm:$0xff]  ;;  %v281_v15 = vld [vmem:[%s1542_s30 + $0x478] sm:$0xff]  ;;  %791 = vst [vmem:[%s1551_s25 + $0x468] sm:$0xff] %v279_v13 }
  0x80   : > { %792 = vst [vmem:[%s1551_s25 + $0x470] sm:$0xff] %v280_v14  ;;  %793 = vst [vmem:[%s1551_s25 + $0x478] sm:$0xff] %v281_v15  ;;  %v282_v16 = vld [vmem:[%s1542_s30 + $0x480] sm:$0xff]  ;;  %v283_v17 = vld [vmem:[%s1542_s30 + $0x488] sm:$0xff] }
  0x81   : > { %v284_v18 = vld [vmem:[%s1542_s30 + $0x490] sm:$0xff]  ;;  %794 = vst [vmem:[%s1551_s25 + $0x480] sm:$0xff] %v282_v16  ;;  %795 = vst [vmem:[%s1551_s25 + $0x488] sm:$0xff] %v283_v17  ;;  %v285_v19 = vld [vmem:[%s1542_s30 + $0x498] sm:$0xff] }
  0x82   : > { %796 = vst [vmem:[%s1551_s25 + $0x490] sm:$0xff] %v284_v18  ;;  %v286_v20 = vld [vmem:[%s1542_s30 + $0x4a0] sm:$0xff]  ;;  %v287_v21 = vld [vmem:[%s1542_s30 + $0x4a8] sm:$0xff]  ;;  %797 = vst [vmem:[%s1551_s25 + $0x498] sm:$0xff] %v285_v19 }
  0x83   : > { %798 = vst [vmem:[%s1551_s25 + $0x4a0] sm:$0xff] %v286_v20  ;;  %799 = vst [vmem:[%s1551_s25 + $0x4a8] sm:$0xff] %v287_v21  ;;  %v288_v22 = vld [vmem:[%s1542_s30 + $0x4b0] sm:$0xff]  ;;  %v289_v23 = vld [vmem:[%s1542_s30 + $0x4b8] sm:$0xff] }
  0x84   : > { %v290_v24 = vld [vmem:[%s1542_s30 + $0x4c0] sm:$0xff]  ;;  %800 = vst [vmem:[%s1551_s25 + $0x4b0] sm:$0xff] %v288_v22  ;;  %801 = vst [vmem:[%s1551_s25 + $0x4b8] sm:$0xff] %v289_v23  ;;  %v291_v25 = vld [vmem:[%s1542_s30 + $0x4c8] sm:$0xff] }
  0x85   : > { %802 = vst [vmem:[%s1551_s25 + $0x4c0] sm:$0xff] %v290_v24  ;;  %v292_v26 = vld [vmem:[%s1542_s30 + $0x4d0] sm:$0xff]  ;;  %v293_v27 = vld [vmem:[%s1542_s30 + $0x4d8] sm:$0xff]  ;;  %803 = vst [vmem:[%s1551_s25 + $0x4c8] sm:$0xff] %v291_v25 }
  0x86   : > { %804 = vst [vmem:[%s1551_s25 + $0x4d0] sm:$0xff] %v292_v26  ;;  %805 = vst [vmem:[%s1551_s25 + $0x4d8] sm:$0xff] %v293_v27  ;;  %v294_v28 = vld [vmem:[%s1542_s30 + $0x4e0] sm:$0xff]  ;;  %v295_v29 = vld [vmem:[%s1542_s30 + $0x4e8] sm:$0xff] }
  0x87   : > { %v296_v30 = vld [vmem:[%s1542_s30 + $0x4f0] sm:$0xff]  ;;  %806 = vst [vmem:[%s1551_s25 + $0x4e0] sm:$0xff] %v294_v28  ;;  %807 = vst [vmem:[%s1551_s25 + $0x4e8] sm:$0xff] %v295_v29  ;;  %v297_v31 = vld [vmem:[%s1542_s30 + $0x4f8] sm:$0xff] }
  0x88   : > { %808 = vst [vmem:[%s1551_s25 + $0x4f0] sm:$0xff] %v296_v30  ;;  %v298_v32 = vld [vmem:[%s1542_s30 + $0x500] sm:$0xff]  ;;  %v299_v33 = vld [vmem:[%s1542_s30 + $0x508] sm:$0xff]  ;;  %809 = vst [vmem:[%s1551_s25 + $0x4f8] sm:$0xff] %v297_v31 }
  0x89   : > { %810 = vst [vmem:[%s1551_s25 + $0x500] sm:$0xff] %v298_v32  ;;  %811 = vst [vmem:[%s1551_s25 + $0x508] sm:$0xff] %v299_v33  ;;  %v300_v34 = vld [vmem:[%s1542_s30 + $0x510] sm:$0xff]  ;;  %v301_v35 = vld [vmem:[%s1542_s30 + $0x518] sm:$0xff] }
  0x8a   : > { %v302_v36 = vld [vmem:[%s1542_s30 + $0x520] sm:$0xff]  ;;  %812 = vst [vmem:[%s1551_s25 + $0x510] sm:$0xff] %v300_v34  ;;  %813 = vst [vmem:[%s1551_s25 + $0x518] sm:$0xff] %v301_v35  ;;  %v303_v37 = vld [vmem:[%s1542_s30 + $0x528] sm:$0xff] }
  0x8b   : > { %814 = vst [vmem:[%s1551_s25 + $0x520] sm:$0xff] %v302_v36  ;;  %v304_v38 = vld [vmem:[%s1542_s30 + $0x530] sm:$0xff]  ;;  %v305_v39 = vld [vmem:[%s1542_s30 + $0x538] sm:$0xff]  ;;  %815 = vst [vmem:[%s1551_s25 + $0x528] sm:$0xff] %v303_v37 }
  0x8c   : > { %816 = vst [vmem:[%s1551_s25 + $0x530] sm:$0xff] %v304_v38  ;;  %817 = vst [vmem:[%s1551_s25 + $0x538] sm:$0xff] %v305_v39  ;;  %v306_v40 = vld [vmem:[%s1542_s30 + $0x540] sm:$0xff]  ;;  %v307_v41 = vld [vmem:[%s1542_s30 + $0x548] sm:$0xff] }
  0x8d   : > { %v308_v42 = vld [vmem:[%s1542_s30 + $0x550] sm:$0xff]  ;;  %818 = vst [vmem:[%s1551_s25 + $0x540] sm:$0xff] %v306_v40  ;;  %819 = vst [vmem:[%s1551_s25 + $0x548] sm:$0xff] %v307_v41  ;;  %v309_v43 = vld [vmem:[%s1542_s30 + $0x558] sm:$0xff] }
  0x8e   : > { %820 = vst [vmem:[%s1551_s25 + $0x550] sm:$0xff] %v308_v42  ;;  %v310_v44 = vld [vmem:[%s1542_s30 + $0x560] sm:$0xff]  ;;  %v311_v45 = vld [vmem:[%s1542_s30 + $0x568] sm:$0xff]  ;;  %821 = vst [vmem:[%s1551_s25 + $0x558] sm:$0xff] %v309_v43 }
  0x8f   : > { %822 = vst [vmem:[%s1551_s25 + $0x560] sm:$0xff] %v310_v44  ;;  %823 = vst [vmem:[%s1551_s25 + $0x568] sm:$0xff] %v311_v45  ;;  %v312_v46 = vld [vmem:[%s1542_s30 + $0x570] sm:$0xff]  ;;  %v313_v47 = vld [vmem:[%s1542_s30 + $0x578] sm:$0xff] }
  0x90   : > { %v314_v48 = vld [vmem:[%s1542_s30 + $0x580] sm:$0xff]  ;;  %824 = vst [vmem:[%s1551_s25 + $0x570] sm:$0xff] %v312_v46  ;;  %825 = vst [vmem:[%s1551_s25 + $0x578] sm:$0xff] %v313_v47  ;;  %v315_v49 = vld [vmem:[%s1542_s30 + $0x588] sm:$0xff] }
  0x91   : > { %826 = vst [vmem:[%s1551_s25 + $0x580] sm:$0xff] %v314_v48  ;;  %v316_v50 = vld [vmem:[%s1542_s30 + $0x590] sm:$0xff]  ;;  %v317_v51 = vld [vmem:[%s1542_s30 + $0x598] sm:$0xff]  ;;  %827 = vst [vmem:[%s1551_s25 + $0x588] sm:$0xff] %v315_v49 }
  0x92   : > { %828 = vst [vmem:[%s1551_s25 + $0x590] sm:$0xff] %v316_v50  ;;  %829 = vst [vmem:[%s1551_s25 + $0x598] sm:$0xff] %v317_v51  ;;  %v318_v52 = vld [vmem:[%s1542_s30 + $0x5a0] sm:$0xff]  ;;  %v319_v53 = vld [vmem:[%s1542_s30 + $0x5a8] sm:$0xff] }
  0x93   : > { %v320_v54 = vld [vmem:[%s1542_s30 + $0x5b0] sm:$0xff]  ;;  %830 = vst [vmem:[%s1551_s25 + $0x5a0] sm:$0xff] %v318_v52  ;;  %831 = vst [vmem:[%s1551_s25 + $0x5a8] sm:$0xff] %v319_v53  ;;  %v321_v55 = vld [vmem:[%s1542_s30 + $0x5b8] sm:$0xff] }
  0x94   : > { %832 = vst [vmem:[%s1551_s25 + $0x5b0] sm:$0xff] %v320_v54  ;;  %v322_v56 = vld [vmem:[%s1542_s30 + $0x5c0] sm:$0xff]  ;;  %v323_v57 = vld [vmem:[%s1542_s30 + $0x5c8] sm:$0xff]  ;;  %833 = vst [vmem:[%s1551_s25 + $0x5b8] sm:$0xff] %v321_v55 }
  0x95   : > { %834 = vst [vmem:[%s1551_s25 + $0x5c0] sm:$0xff] %v322_v56  ;;  %835 = vst [vmem:[%s1551_s25 + $0x5c8] sm:$0xff] %v323_v57  ;;  %v324_v58 = vld [vmem:[%s1542_s30 + $0x5d0] sm:$0xff]  ;;  %v325_v59 = vld [vmem:[%s1542_s30 + $0x5d8] sm:$0xff] }
  0x96   : > { %v326_v60 = vld [vmem:[%s1542_s30 + $0x5e0] sm:$0xff]  ;;  %836 = vst [vmem:[%s1551_s25 + $0x5d0] sm:$0xff] %v324_v58  ;;  %837 = vst [vmem:[%s1551_s25 + $0x5d8] sm:$0xff] %v325_v59  ;;  %v327_v61 = vld [vmem:[%s1542_s30 + $0x5e8] sm:$0xff] }
  0x97   : > { %838 = vst [vmem:[%s1551_s25 + $0x5e0] sm:$0xff] %v326_v60  ;;  %v328_v62 = vld [vmem:[%s1542_s30 + $0x5f0] sm:$0xff]  ;;  %v329_v63 = vld [vmem:[%s1542_s30 + $0x5f8] sm:$0xff]  ;;  %839 = vst [vmem:[%s1551_s25 + $0x5e8] sm:$0xff] %v327_v61 }
  0x98   : > { %840 = vst [vmem:[%s1551_s25 + $0x5f0] sm:$0xff] %v328_v62  ;;  %841 = vst [vmem:[%s1551_s25 + $0x5f8] sm:$0xff] %v329_v63  ;;  %v330_v0 = vld [vmem:[%s1542_s30 + $0x600] sm:$0xff]  ;;  %v331_v1 = vld [vmem:[%s1542_s30 + $0x608] sm:$0xff] }
  0x99   : > { %v332_v2 = vld [vmem:[%s1542_s30 + $0x610] sm:$0xff]  ;;  %842 = vst [vmem:[%s1551_s25 + $0x600] sm:$0xff] %v330_v0  ;;  %843 = vst [vmem:[%s1551_s25 + $0x608] sm:$0xff] %v331_v1  ;;  %v333_v3 = vld [vmem:[%s1542_s30 + $0x618] sm:$0xff] }
  0x9a   : > { %844 = vst [vmem:[%s1551_s25 + $0x610] sm:$0xff] %v332_v2  ;;  %v334_v4 = vld [vmem:[%s1542_s30 + $0x620] sm:$0xff]  ;;  %v335_v5 = vld [vmem:[%s1542_s30 + $0x628] sm:$0xff]  ;;  %845 = vst [vmem:[%s1551_s25 + $0x618] sm:$0xff] %v333_v3 }
  0x9b   : > { %846 = vst [vmem:[%s1551_s25 + $0x620] sm:$0xff] %v334_v4  ;;  %847 = vst [vmem:[%s1551_s25 + $0x628] sm:$0xff] %v335_v5  ;;  %v336_v6 = vld [vmem:[%s1542_s30 + $0x630] sm:$0xff]  ;;  %v337_v7 = vld [vmem:[%s1542_s30 + $0x638] sm:$0xff] }
  0x9c   : > { %v338_v8 = vld [vmem:[%s1542_s30 + $0x640] sm:$0xff]  ;;  %848 = vst [vmem:[%s1551_s25 + $0x630] sm:$0xff] %v336_v6  ;;  %849 = vst [vmem:[%s1551_s25 + $0x638] sm:$0xff] %v337_v7  ;;  %v339_v9 = vld [vmem:[%s1542_s30 + $0x648] sm:$0xff] }
  0x9d   : > { %850 = vst [vmem:[%s1551_s25 + $0x640] sm:$0xff] %v338_v8  ;;  %v340_v10 = vld [vmem:[%s1542_s30 + $0x650] sm:$0xff]  ;;  %v341_v11 = vld [vmem:[%s1542_s30 + $0x658] sm:$0xff]  ;;  %851 = vst [vmem:[%s1551_s25 + $0x648] sm:$0xff] %v339_v9 }
  0x9e   : > { %852 = vst [vmem:[%s1551_s25 + $0x650] sm:$0xff] %v340_v10  ;;  %853 = vst [vmem:[%s1551_s25 + $0x658] sm:$0xff] %v341_v11  ;;  %v342_v12 = vld [vmem:[%s1542_s30 + $0x660] sm:$0xff]  ;;  %v343_v13 = vld [vmem:[%s1542_s30 + $0x668] sm:$0xff] }
  0x9f   : > { %v344_v14 = vld [vmem:[%s1542_s30 + $0x670] sm:$0xff]  ;;  %854 = vst [vmem:[%s1551_s25 + $0x660] sm:$0xff] %v342_v12  ;;  %855 = vst [vmem:[%s1551_s25 + $0x668] sm:$0xff] %v343_v13  ;;  %v345_v15 = vld [vmem:[%s1542_s30 + $0x678] sm:$0xff] }
  0xa0   : > { %856 = vst [vmem:[%s1551_s25 + $0x670] sm:$0xff] %v344_v14  ;;  %v346_v16 = vld [vmem:[%s1542_s30 + $0x680] sm:$0xff]  ;;  %v347_v17 = vld [vmem:[%s1542_s30 + $0x688] sm:$0xff]  ;;  %857 = vst [vmem:[%s1551_s25 + $0x678] sm:$0xff] %v345_v15 }
  0xa1   : > { %858 = vst [vmem:[%s1551_s25 + $0x680] sm:$0xff] %v346_v16  ;;  %859 = vst [vmem:[%s1551_s25 + $0x688] sm:$0xff] %v347_v17  ;;  %v348_v18 = vld [vmem:[%s1542_s30 + $0x690] sm:$0xff]  ;;  %v349_v19 = vld [vmem:[%s1542_s30 + $0x698] sm:$0xff] }
  0xa2   : > { %v350_v20 = vld [vmem:[%s1542_s30 + $0x6a0] sm:$0xff]  ;;  %860 = vst [vmem:[%s1551_s25 + $0x690] sm:$0xff] %v348_v18  ;;  %861 = vst [vmem:[%s1551_s25 + $0x698] sm:$0xff] %v349_v19  ;;  %v351_v21 = vld [vmem:[%s1542_s30 + $0x6a8] sm:$0xff] }
  0xa3   : > { %862 = vst [vmem:[%s1551_s25 + $0x6a0] sm:$0xff] %v350_v20  ;;  %v352_v22 = vld [vmem:[%s1542_s30 + $0x6b0] sm:$0xff]  ;;  %v353_v23 = vld [vmem:[%s1542_s30 + $0x6b8] sm:$0xff]  ;;  %863 = vst [vmem:[%s1551_s25 + $0x6a8] sm:$0xff] %v351_v21 }
  0xa4   : > { %864 = vst [vmem:[%s1551_s25 + $0x6b0] sm:$0xff] %v352_v22  ;;  %865 = vst [vmem:[%s1551_s25 + $0x6b8] sm:$0xff] %v353_v23  ;;  %v354_v24 = vld [vmem:[%s1542_s30 + $0x6c0] sm:$0xff]  ;;  %v355_v25 = vld [vmem:[%s1542_s30 + $0x6c8] sm:$0xff] }
  0xa5   : > { %v356_v26 = vld [vmem:[%s1542_s30 + $0x6d0] sm:$0xff]  ;;  %866 = vst [vmem:[%s1551_s25 + $0x6c0] sm:$0xff] %v354_v24  ;;  %867 = vst [vmem:[%s1551_s25 + $0x6c8] sm:$0xff] %v355_v25  ;;  %v357_v27 = vld [vmem:[%s1542_s30 + $0x6d8] sm:$0xff] }
  0xa6   : > { %868 = vst [vmem:[%s1551_s25 + $0x6d0] sm:$0xff] %v356_v26  ;;  %v358_v28 = vld [vmem:[%s1542_s30 + $0x6e0] sm:$0xff]  ;;  %v359_v29 = vld [vmem:[%s1542_s30 + $0x6e8] sm:$0xff]  ;;  %869 = vst [vmem:[%s1551_s25 + $0x6d8] sm:$0xff] %v357_v27 }
  0xa7   : > { %870 = vst [vmem:[%s1551_s25 + $0x6e0] sm:$0xff] %v358_v28  ;;  %871 = vst [vmem:[%s1551_s25 + $0x6e8] sm:$0xff] %v359_v29  ;;  %v360_v30 = vld [vmem:[%s1542_s30 + $0x6f0] sm:$0xff]  ;;  %v361_v31 = vld [vmem:[%s1542_s30 + $0x6f8] sm:$0xff] }
  0xa8   : > { %v362_v32 = vld [vmem:[%s1542_s30 + $0x700] sm:$0xff]  ;;  %872 = vst [vmem:[%s1551_s25 + $0x6f0] sm:$0xff] %v360_v30  ;;  %873 = vst [vmem:[%s1551_s25 + $0x6f8] sm:$0xff] %v361_v31  ;;  %v363_v33 = vld [vmem:[%s1542_s30 + $0x708] sm:$0xff] }
  0xa9   : > { %874 = vst [vmem:[%s1551_s25 + $0x700] sm:$0xff] %v362_v32  ;;  %v364_v34 = vld [vmem:[%s1542_s30 + $0x710] sm:$0xff]  ;;  %v365_v35 = vld [vmem:[%s1542_s30 + $0x718] sm:$0xff]  ;;  %875 = vst [vmem:[%s1551_s25 + $0x708] sm:$0xff] %v363_v33 }
  0xaa   : > { %876 = vst [vmem:[%s1551_s25 + $0x710] sm:$0xff] %v364_v34  ;;  %877 = vst [vmem:[%s1551_s25 + $0x718] sm:$0xff] %v365_v35  ;;  %v366_v36 = vld [vmem:[%s1542_s30 + $0x720] sm:$0xff]  ;;  %v367_v37 = vld [vmem:[%s1542_s30 + $0x728] sm:$0xff] }
  0xab   : > { %v368_v38 = vld [vmem:[%s1542_s30 + $0x730] sm:$0xff]  ;;  %878 = vst [vmem:[%s1551_s25 + $0x720] sm:$0xff] %v366_v36  ;;  %879 = vst [vmem:[%s1551_s25 + $0x728] sm:$0xff] %v367_v37  ;;  %v369_v39 = vld [vmem:[%s1542_s30 + $0x738] sm:$0xff] }
  0xac   : > { %880 = vst [vmem:[%s1551_s25 + $0x730] sm:$0xff] %v368_v38  ;;  %v370_v40 = vld [vmem:[%s1542_s30 + $0x740] sm:$0xff]  ;;  %v371_v41 = vld [vmem:[%s1542_s30 + $0x748] sm:$0xff]  ;;  %881 = vst [vmem:[%s1551_s25 + $0x738] sm:$0xff] %v369_v39 }
  0xad   : > { %882 = vst [vmem:[%s1551_s25 + $0x740] sm:$0xff] %v370_v40  ;;  %883 = vst [vmem:[%s1551_s25 + $0x748] sm:$0xff] %v371_v41  ;;  %v372_v42 = vld [vmem:[%s1542_s30 + $0x750] sm:$0xff]  ;;  %v373_v43 = vld [vmem:[%s1542_s30 + $0x758] sm:$0xff] }
  0xae   : > { %v374_v44 = vld [vmem:[%s1542_s30 + $0x760] sm:$0xff]  ;;  %884 = vst [vmem:[%s1551_s25 + $0x750] sm:$0xff] %v372_v42  ;;  %885 = vst [vmem:[%s1551_s25 + $0x758] sm:$0xff] %v373_v43  ;;  %v375_v45 = vld [vmem:[%s1542_s30 + $0x768] sm:$0xff] }
  0xaf   : > { %886 = vst [vmem:[%s1551_s25 + $0x760] sm:$0xff] %v374_v44  ;;  %v376_v46 = vld [vmem:[%s1542_s30 + $0x770] sm:$0xff]  ;;  %v377_v47 = vld [vmem:[%s1542_s30 + $0x778] sm:$0xff]  ;;  %887 = vst [vmem:[%s1551_s25 + $0x768] sm:$0xff] %v375_v45 }
  0xb0   : > { %888 = vst [vmem:[%s1551_s25 + $0x770] sm:$0xff] %v376_v46  ;;  %889 = vst [vmem:[%s1551_s25 + $0x778] sm:$0xff] %v377_v47  ;;  %v378_v48 = vld [vmem:[%s1542_s30 + $0x780] sm:$0xff]  ;;  %v379_v49 = vld [vmem:[%s1542_s30 + $0x788] sm:$0xff] }
  0xb1   : > { %v380_v50 = vld [vmem:[%s1542_s30 + $0x790] sm:$0xff]  ;;  %890 = vst [vmem:[%s1551_s25 + $0x780] sm:$0xff] %v378_v48  ;;  %891 = vst [vmem:[%s1551_s25 + $0x788] sm:$0xff] %v379_v49  ;;  %v381_v51 = vld [vmem:[%s1542_s30 + $0x798] sm:$0xff] }
  0xb2   : > { %892 = vst [vmem:[%s1551_s25 + $0x790] sm:$0xff] %v380_v50  ;;  %v382_v52 = vld [vmem:[%s1542_s30 + $0x7a0] sm:$0xff]  ;;  %v383_v53 = vld [vmem:[%s1542_s30 + $0x7a8] sm:$0xff]  ;;  %893 = vst [vmem:[%s1551_s25 + $0x798] sm:$0xff] %v381_v51 }
  0xb3   : > { %894 = vst [vmem:[%s1551_s25 + $0x7a0] sm:$0xff] %v382_v52  ;;  %895 = vst [vmem:[%s1551_s25 + $0x7a8] sm:$0xff] %v383_v53  ;;  %v384_v54 = vld [vmem:[%s1542_s30 + $0x7b0] sm:$0xff]  ;;  %v385_v55 = vld [vmem:[%s1542_s30 + $0x7b8] sm:$0xff] }
  0xb4   : > { %v386_v56 = vld [vmem:[%s1542_s30 + $0x7c0] sm:$0xff]  ;;  %896 = vst [vmem:[%s1551_s25 + $0x7b0] sm:$0xff] %v384_v54  ;;  %897 = vst [vmem:[%s1551_s25 + $0x7b8] sm:$0xff] %v385_v55  ;;  %v387_v57 = vld [vmem:[%s1542_s30 + $0x7c8] sm:$0xff] }
  0xb5   : > { %898 = vst [vmem:[%s1551_s25 + $0x7c0] sm:$0xff] %v386_v56  ;;  %v388_v58 = vld [vmem:[%s1542_s30 + $0x7d0] sm:$0xff]  ;;  %v389_v59 = vld [vmem:[%s1542_s30 + $0x7d8] sm:$0xff]  ;;  %899 = vst [vmem:[%s1551_s25 + $0x7c8] sm:$0xff] %v387_v57 }
  0xb6   : > { %900 = vst [vmem:[%s1551_s25 + $0x7d0] sm:$0xff] %v388_v58  ;;  %901 = vst [vmem:[%s1551_s25 + $0x7d8] sm:$0xff] %v389_v59  ;;  %v390_v60 = vld [vmem:[%s1542_s30 + $0x7e0] sm:$0xff]  ;;  %v391_v61 = vld [vmem:[%s1542_s30 + $0x7e8] sm:$0xff] }
  0xb7   : > { %v392_v62 = vld [vmem:[%s1542_s30 + $0x7f0] sm:$0xff]  ;;  %902 = vst [vmem:[%s1551_s25 + $0x7e0] sm:$0xff] %v390_v60  ;;  %903 = vst [vmem:[%s1551_s25 + $0x7e8] sm:$0xff] %v391_v61  ;;  %v393_v63 = vld [vmem:[%s1542_s30 + $0x7f8] sm:$0xff] }
  0xb8   : > { %904 = vst [vmem:[%s1551_s25 + $0x7f0] sm:$0xff] %v392_v62  ;;  %v394_v0 = vld [vmem:[%s1542_s30 + $0x800] sm:$0xff]  ;;  %v395_v1 = vld [vmem:[%s1542_s30 + $0x808] sm:$0xff]  ;;  %905 = vst [vmem:[%s1551_s25 + $0x7f8] sm:$0xff] %v393_v63 }
  0xb9   : > { %906 = vst [vmem:[%s1551_s25 + $0x800] sm:$0xff] %v394_v0  ;;  %907 = vst [vmem:[%s1551_s25 + $0x808] sm:$0xff] %v395_v1  ;;  %v396_v2 = vld [vmem:[%s1542_s30 + $0x810] sm:$0xff]  ;;  %v397_v3 = vld [vmem:[%s1542_s30 + $0x818] sm:$0xff] }
  0xba   : > { %v398_v4 = vld [vmem:[%s1542_s30 + $0x820] sm:$0xff]  ;;  %908 = vst [vmem:[%s1551_s25 + $0x810] sm:$0xff] %v396_v2  ;;  %909 = vst [vmem:[%s1551_s25 + $0x818] sm:$0xff] %v397_v3  ;;  %v399_v5 = vld [vmem:[%s1542_s30 + $0x828] sm:$0xff] }
  0xbb   : > { %910 = vst [vmem:[%s1551_s25 + $0x820] sm:$0xff] %v398_v4  ;;  %v400_v6 = vld [vmem:[%s1542_s30 + $0x830] sm:$0xff]  ;;  %v401_v7 = vld [vmem:[%s1542_s30 + $0x838] sm:$0xff]  ;;  %911 = vst [vmem:[%s1551_s25 + $0x828] sm:$0xff] %v399_v5 }
  0xbc   : > { %912 = vst [vmem:[%s1551_s25 + $0x830] sm:$0xff] %v400_v6  ;;  %913 = vst [vmem:[%s1551_s25 + $0x838] sm:$0xff] %v401_v7  ;;  %v402_v8 = vld [vmem:[%s1542_s30 + $0x840] sm:$0xff]  ;;  %v403_v9 = vld [vmem:[%s1542_s30 + $0x848] sm:$0xff] }
  0xbd   : > { %v404_v10 = vld [vmem:[%s1542_s30 + $0x850] sm:$0xff]  ;;  %914 = vst [vmem:[%s1551_s25 + $0x840] sm:$0xff] %v402_v8  ;;  %915 = vst [vmem:[%s1551_s25 + $0x848] sm:$0xff] %v403_v9  ;;  %v405_v11 = vld [vmem:[%s1542_s30 + $0x858] sm:$0xff] }
  0xbe   : > { %916 = vst [vmem:[%s1551_s25 + $0x850] sm:$0xff] %v404_v10  ;;  %v406_v12 = vld [vmem:[%s1542_s30 + $0x860] sm:$0xff]  ;;  %v407_v13 = vld [vmem:[%s1542_s30 + $0x868] sm:$0xff]  ;;  %917 = vst [vmem:[%s1551_s25 + $0x858] sm:$0xff] %v405_v11 }
  0xbf   : > { %918 = vst [vmem:[%s1551_s25 + $0x860] sm:$0xff] %v406_v12  ;;  %919 = vst [vmem:[%s1551_s25 + $0x868] sm:$0xff] %v407_v13  ;;  %v408_v14 = vld [vmem:[%s1542_s30 + $0x870] sm:$0xff]  ;;  %v409_v15 = vld [vmem:[%s1542_s30 + $0x878] sm:$0xff] }
  0xc0   : > { %v410_v16 = vld [vmem:[%s1542_s30 + $0x880] sm:$0xff]  ;;  %920 = vst [vmem:[%s1551_s25 + $0x870] sm:$0xff] %v408_v14  ;;  %921 = vst [vmem:[%s1551_s25 + $0x878] sm:$0xff] %v409_v15  ;;  %v411_v17 = vld [vmem:[%s1542_s30 + $0x888] sm:$0xff] }
  0xc1   : > { %922 = vst [vmem:[%s1551_s25 + $0x880] sm:$0xff] %v410_v16  ;;  %v412_v18 = vld [vmem:[%s1542_s30 + $0x890] sm:$0xff]  ;;  %v413_v19 = vld [vmem:[%s1542_s30 + $0x898] sm:$0xff]  ;;  %923 = vst [vmem:[%s1551_s25 + $0x888] sm:$0xff] %v411_v17 }
  0xc2   : > { %924 = vst [vmem:[%s1551_s25 + $0x890] sm:$0xff] %v412_v18  ;;  %925 = vst [vmem:[%s1551_s25 + $0x898] sm:$0xff] %v413_v19  ;;  %v414_v20 = vld [vmem:[%s1542_s30 + $0x8a0] sm:$0xff]  ;;  %v415_v21 = vld [vmem:[%s1542_s30 + $0x8a8] sm:$0xff] }
  0xc3   : > { %v416_v22 = vld [vmem:[%s1542_s30 + $0x8b0] sm:$0xff]  ;;  %926 = vst [vmem:[%s1551_s25 + $0x8a0] sm:$0xff] %v414_v20  ;;  %927 = vst [vmem:[%s1551_s25 + $0x8a8] sm:$0xff] %v415_v21  ;;  %v417_v23 = vld [vmem:[%s1542_s30 + $0x8b8] sm:$0xff] }
  0xc4   : > { %928 = vst [vmem:[%s1551_s25 + $0x8b0] sm:$0xff] %v416_v22  ;;  %v418_v24 = vld [vmem:[%s1542_s30 + $0x8c0] sm:$0xff]  ;;  %v419_v25 = vld [vmem:[%s1542_s30 + $0x8c8] sm:$0xff]  ;;  %929 = vst [vmem:[%s1551_s25 + $0x8b8] sm:$0xff] %v417_v23 }
  0xc5   : > { %930 = vst [vmem:[%s1551_s25 + $0x8c0] sm:$0xff] %v418_v24  ;;  %931 = vst [vmem:[%s1551_s25 + $0x8c8] sm:$0xff] %v419_v25  ;;  %v420_v26 = vld [vmem:[%s1542_s30 + $0x8d0] sm:$0xff]  ;;  %v421_v27 = vld [vmem:[%s1542_s30 + $0x8d8] sm:$0xff] }
  0xc6   : > { %v422_v28 = vld [vmem:[%s1542_s30 + $0x8e0] sm:$0xff]  ;;  %932 = vst [vmem:[%s1551_s25 + $0x8d0] sm:$0xff] %v420_v26  ;;  %933 = vst [vmem:[%s1551_s25 + $0x8d8] sm:$0xff] %v421_v27  ;;  %v423_v29 = vld [vmem:[%s1542_s30 + $0x8e8] sm:$0xff] }
  0xc7   : > { %934 = vst [vmem:[%s1551_s25 + $0x8e0] sm:$0xff] %v422_v28  ;;  %v424_v30 = vld [vmem:[%s1542_s30 + $0x8f0] sm:$0xff]  ;;  %v425_v31 = vld [vmem:[%s1542_s30 + $0x8f8] sm:$0xff]  ;;  %935 = vst [vmem:[%s1551_s25 + $0x8e8] sm:$0xff] %v423_v29 }
  0xc8   : > { %936 = vst [vmem:[%s1551_s25 + $0x8f0] sm:$0xff] %v424_v30  ;;  %937 = vst [vmem:[%s1551_s25 + $0x8f8] sm:$0xff] %v425_v31  ;;  %v426_v32 = vld [vmem:[%s1542_s30 + $0x900] sm:$0xff]  ;;  %v427_v33 = vld [vmem:[%s1542_s30 + $0x908] sm:$0xff] }
  0xc9   : > { %v428_v34 = vld [vmem:[%s1542_s30 + $0x910] sm:$0xff]  ;;  %938 = vst [vmem:[%s1551_s25 + $0x900] sm:$0xff] %v426_v32  ;;  %939 = vst [vmem:[%s1551_s25 + $0x908] sm:$0xff] %v427_v33  ;;  %v429_v35 = vld [vmem:[%s1542_s30 + $0x918] sm:$0xff] }
  0xca   : > { %940 = vst [vmem:[%s1551_s25 + $0x910] sm:$0xff] %v428_v34  ;;  %v430_v36 = vld [vmem:[%s1542_s30 + $0x920] sm:$0xff]  ;;  %v431_v37 = vld [vmem:[%s1542_s30 + $0x928] sm:$0xff]  ;;  %941 = vst [vmem:[%s1551_s25 + $0x918] sm:$0xff] %v429_v35 }
  0xcb   : > { %942 = vst [vmem:[%s1551_s25 + $0x920] sm:$0xff] %v430_v36  ;;  %943 = vst [vmem:[%s1551_s25 + $0x928] sm:$0xff] %v431_v37  ;;  %v432_v38 = vld [vmem:[%s1542_s30 + $0x930] sm:$0xff]  ;;  %v433_v39 = vld [vmem:[%s1542_s30 + $0x938] sm:$0xff] }
  0xcc   : > { %v434_v40 = vld [vmem:[%s1542_s30 + $0x940] sm:$0xff]  ;;  %944 = vst [vmem:[%s1551_s25 + $0x930] sm:$0xff] %v432_v38  ;;  %945 = vst [vmem:[%s1551_s25 + $0x938] sm:$0xff] %v433_v39  ;;  %v435_v41 = vld [vmem:[%s1542_s30 + $0x948] sm:$0xff] }
  0xcd   : > { %946 = vst [vmem:[%s1551_s25 + $0x940] sm:$0xff] %v434_v40  ;;  %v436_v42 = vld [vmem:[%s1542_s30 + $0x950] sm:$0xff]  ;;  %v437_v43 = vld [vmem:[%s1542_s30 + $0x958] sm:$0xff]  ;;  %947 = vst [vmem:[%s1551_s25 + $0x948] sm:$0xff] %v435_v41 }
  0xce   : > { %948 = vst [vmem:[%s1551_s25 + $0x950] sm:$0xff] %v436_v42  ;;  %949 = vst [vmem:[%s1551_s25 + $0x958] sm:$0xff] %v437_v43  ;;  %v438_v44 = vld [vmem:[%s1542_s30 + $0x960] sm:$0xff]  ;;  %v439_v45 = vld [vmem:[%s1542_s30 + $0x968] sm:$0xff] }
  0xcf   : > { %v440_v46 = vld [vmem:[%s1542_s30 + $0x970] sm:$0xff]  ;;  %950 = vst [vmem:[%s1551_s25 + $0x960] sm:$0xff] %v438_v44  ;;  %951 = vst [vmem:[%s1551_s25 + $0x968] sm:$0xff] %v439_v45  ;;  %v441_v47 = vld [vmem:[%s1542_s30 + $0x978] sm:$0xff] }
  0xd0   : > { %952 = vst [vmem:[%s1551_s25 + $0x970] sm:$0xff] %v440_v46  ;;  %v442_v48 = vld [vmem:[%s1542_s30 + $0x980] sm:$0xff]  ;;  %v443_v49 = vld [vmem:[%s1542_s30 + $0x988] sm:$0xff]  ;;  %953 = vst [vmem:[%s1551_s25 + $0x978] sm:$0xff] %v441_v47 }
  0xd1   : > { %954 = vst [vmem:[%s1551_s25 + $0x980] sm:$0xff] %v442_v48  ;;  %955 = vst [vmem:[%s1551_s25 + $0x988] sm:$0xff] %v443_v49  ;;  %v444_v50 = vld [vmem:[%s1542_s30 + $0x990] sm:$0xff]  ;;  %v445_v51 = vld [vmem:[%s1542_s30 + $0x998] sm:$0xff] }
  0xd2   : > { %v446_v52 = vld [vmem:[%s1542_s30 + $0x9a0] sm:$0xff]  ;;  %956 = vst [vmem:[%s1551_s25 + $0x990] sm:$0xff] %v444_v50  ;;  %957 = vst [vmem:[%s1551_s25 + $0x998] sm:$0xff] %v445_v51  ;;  %v447_v53 = vld [vmem:[%s1542_s30 + $0x9a8] sm:$0xff] }
  0xd3   : > { %958 = vst [vmem:[%s1551_s25 + $0x9a0] sm:$0xff] %v446_v52  ;;  %v448_v54 = vld [vmem:[%s1542_s30 + $0x9b0] sm:$0xff]  ;;  %v449_v55 = vld [vmem:[%s1542_s30 + $0x9b8] sm:$0xff]  ;;  %959 = vst [vmem:[%s1551_s25 + $0x9a8] sm:$0xff] %v447_v53 }
  0xd4   : > { %960 = vst [vmem:[%s1551_s25 + $0x9b0] sm:$0xff] %v448_v54  ;;  %961 = vst [vmem:[%s1551_s25 + $0x9b8] sm:$0xff] %v449_v55  ;;  %v450_v56 = vld [vmem:[%s1542_s30 + $0x9c0] sm:$0xff]  ;;  %v451_v57 = vld [vmem:[%s1542_s30 + $0x9c8] sm:$0xff] }
  0xd5   : > { %v452_v58 = vld [vmem:[%s1542_s30 + $0x9d0] sm:$0xff]  ;;  %962 = vst [vmem:[%s1551_s25 + $0x9c0] sm:$0xff] %v450_v56  ;;  %963 = vst [vmem:[%s1551_s25 + $0x9c8] sm:$0xff] %v451_v57  ;;  %v453_v59 = vld [vmem:[%s1542_s30 + $0x9d8] sm:$0xff] }
  0xd6   : > { %964 = vst [vmem:[%s1551_s25 + $0x9d0] sm:$0xff] %v452_v58  ;;  %v454_v60 = vld [vmem:[%s1542_s30 + $0x9e0] sm:$0xff]  ;;  %v455_v61 = vld [vmem:[%s1542_s30 + $0x9e8] sm:$0xff]  ;;  %965 = vst [vmem:[%s1551_s25 + $0x9d8] sm:$0xff] %v453_v59 }
  0xd7   : > { %966 = vst [vmem:[%s1551_s25 + $0x9e0] sm:$0xff] %v454_v60  ;;  %967 = vst [vmem:[%s1551_s25 + $0x9e8] sm:$0xff] %v455_v61  ;;  %v456_v62 = vld [vmem:[%s1542_s30 + $0x9f0] sm:$0xff]  ;;  %v457_v63 = vld [vmem:[%s1542_s30 + $0x9f8] sm:$0xff] }
  0xd8   : > { %v458_v0 = vld [vmem:[%s1542_s30 + $0xa00] sm:$0xff]  ;;  %968 = vst [vmem:[%s1551_s25 + $0x9f0] sm:$0xff] %v456_v62  ;;  %969 = vst [vmem:[%s1551_s25 + $0x9f8] sm:$0xff] %v457_v63  ;;  %v459_v1 = vld [vmem:[%s1542_s30 + $0xa08] sm:$0xff] }
  0xd9   : > { %970 = vst [vmem:[%s1551_s25 + $0xa00] sm:$0xff] %v458_v0  ;;  %v460_v2 = vld [vmem:[%s1542_s30 + $0xa10] sm:$0xff]  ;;  %v461_v3 = vld [vmem:[%s1542_s30 + $0xa18] sm:$0xff]  ;;  %971 = vst [vmem:[%s1551_s25 + $0xa08] sm:$0xff] %v459_v1 }
  0xda   : > { %972 = vst [vmem:[%s1551_s25 + $0xa10] sm:$0xff] %v460_v2  ;;  %973 = vst [vmem:[%s1551_s25 + $0xa18] sm:$0xff] %v461_v3  ;;  %v462_v4 = vld [vmem:[%s1542_s30 + $0xa20] sm:$0xff]  ;;  %v463_v5 = vld [vmem:[%s1542_s30 + $0xa28] sm:$0xff] }
  0xdb   : > { %v464_v6 = vld [vmem:[%s1542_s30 + $0xa30] sm:$0xff]  ;;  %974 = vst [vmem:[%s1551_s25 + $0xa20] sm:$0xff] %v462_v4  ;;  %975 = vst [vmem:[%s1551_s25 + $0xa28] sm:$0xff] %v463_v5  ;;  %v465_v7 = vld [vmem:[%s1542_s30 + $0xa38] sm:$0xff] }
  0xdc   : > { %976 = vst [vmem:[%s1551_s25 + $0xa30] sm:$0xff] %v464_v6  ;;  %v466_v8 = vld [vmem:[%s1542_s30 + $0xa40] sm:$0xff]  ;;  %v467_v9 = vld [vmem:[%s1542_s30 + $0xa48] sm:$0xff]  ;;  %977 = vst [vmem:[%s1551_s25 + $0xa38] sm:$0xff] %v465_v7 }
  0xdd   : > { %978 = vst [vmem:[%s1551_s25 + $0xa40] sm:$0xff] %v466_v8  ;;  %979 = vst [vmem:[%s1551_s25 + $0xa48] sm:$0xff] %v467_v9  ;;  %v468_v10 = vld [vmem:[%s1542_s30 + $0xa50] sm:$0xff]  ;;  %v469_v11 = vld [vmem:[%s1542_s30 + $0xa58] sm:$0xff] }
  0xde   : > { %v470_v12 = vld [vmem:[%s1542_s30 + $0xa60] sm:$0xff]  ;;  %980 = vst [vmem:[%s1551_s25 + $0xa50] sm:$0xff] %v468_v10  ;;  %981 = vst [vmem:[%s1551_s25 + $0xa58] sm:$0xff] %v469_v11  ;;  %v471_v13 = vld [vmem:[%s1542_s30 + $0xa68] sm:$0xff] }
  0xdf   : > { %982 = vst [vmem:[%s1551_s25 + $0xa60] sm:$0xff] %v470_v12  ;;  %v472_v14 = vld [vmem:[%s1542_s30 + $0xa70] sm:$0xff]  ;;  %v473_v15 = vld [vmem:[%s1542_s30 + $0xa78] sm:$0xff]  ;;  %983 = vst [vmem:[%s1551_s25 + $0xa68] sm:$0xff] %v471_v13 }
  0xe0   : > { %984 = vst [vmem:[%s1551_s25 + $0xa70] sm:$0xff] %v472_v14  ;;  %985 = vst [vmem:[%s1551_s25 + $0xa78] sm:$0xff] %v473_v15  ;;  %v474_v16 = vld [vmem:[%s1542_s30 + $0xa80] sm:$0xff]  ;;  %v475_v17 = vld [vmem:[%s1542_s30 + $0xa88] sm:$0xff] }
  0xe1   : > { %v476_v18 = vld [vmem:[%s1542_s30 + $0xa90] sm:$0xff]  ;;  %986 = vst [vmem:[%s1551_s25 + $0xa80] sm:$0xff] %v474_v16  ;;  %987 = vst [vmem:[%s1551_s25 + $0xa88] sm:$0xff] %v475_v17  ;;  %v477_v19 = vld [vmem:[%s1542_s30 + $0xa98] sm:$0xff] }
  0xe2   : > { %988 = vst [vmem:[%s1551_s25 + $0xa90] sm:$0xff] %v476_v18  ;;  %v478_v20 = vld [vmem:[%s1542_s30 + $0xaa0] sm:$0xff]  ;;  %v479_v21 = vld [vmem:[%s1542_s30 + $0xaa8] sm:$0xff]  ;;  %989 = vst [vmem:[%s1551_s25 + $0xa98] sm:$0xff] %v477_v19 }
  0xe3   : > { %990 = vst [vmem:[%s1551_s25 + $0xaa0] sm:$0xff] %v478_v20  ;;  %991 = vst [vmem:[%s1551_s25 + $0xaa8] sm:$0xff] %v479_v21  ;;  %v480_v22 = vld [vmem:[%s1542_s30 + $0xab0] sm:$0xff]  ;;  %v481_v23 = vld [vmem:[%s1542_s30 + $0xab8] sm:$0xff] }
  0xe4   : > { %v482_v24 = vld [vmem:[%s1542_s30 + $0xac0] sm:$0xff]  ;;  %992 = vst [vmem:[%s1551_s25 + $0xab0] sm:$0xff] %v480_v22  ;;  %993 = vst [vmem:[%s1551_s25 + $0xab8] sm:$0xff] %v481_v23  ;;  %v483_v25 = vld [vmem:[%s1542_s30 + $0xac8] sm:$0xff] }
  0xe5   : > { %994 = vst [vmem:[%s1551_s25 + $0xac0] sm:$0xff] %v482_v24  ;;  %v484_v26 = vld [vmem:[%s1542_s30 + $0xad0] sm:$0xff]  ;;  %v485_v27 = vld [vmem:[%s1542_s30 + $0xad8] sm:$0xff]  ;;  %995 = vst [vmem:[%s1551_s25 + $0xac8] sm:$0xff] %v483_v25 }
  0xe6   : > { %996 = vst [vmem:[%s1551_s25 + $0xad0] sm:$0xff] %v484_v26  ;;  %997 = vst [vmem:[%s1551_s25 + $0xad8] sm:$0xff] %v485_v27  ;;  %v486_v28 = vld [vmem:[%s1542_s30 + $0xae0] sm:$0xff]  ;;  %v487_v29 = vld [vmem:[%s1542_s30 + $0xae8] sm:$0xff] }
  0xe7   : > { %v488_v30 = vld [vmem:[%s1542_s30 + $0xaf0] sm:$0xff]  ;;  %998 = vst [vmem:[%s1551_s25 + $0xae0] sm:$0xff] %v486_v28  ;;  %999 = vst [vmem:[%s1551_s25 + $0xae8] sm:$0xff] %v487_v29  ;;  %v489_v31 = vld [vmem:[%s1542_s30 + $0xaf8] sm:$0xff] }
  0xe8   : > { %1000 = vst [vmem:[%s1551_s25 + $0xaf0] sm:$0xff] %v488_v30  ;;  %v490_v32 = vld [vmem:[%s1542_s30 + $0xb00] sm:$0xff]  ;;  %v491_v33 = vld [vmem:[%s1542_s30 + $0xb08] sm:$0xff]  ;;  %1001 = vst [vmem:[%s1551_s25 + $0xaf8] sm:$0xff] %v489_v31 }
  0xe9   : > { %1002 = vst [vmem:[%s1551_s25 + $0xb00] sm:$0xff] %v490_v32  ;;  %1003 = vst [vmem:[%s1551_s25 + $0xb08] sm:$0xff] %v491_v33  ;;  %v492_v34 = vld [vmem:[%s1542_s30 + $0xb10] sm:$0xff]  ;;  %v493_v35 = vld [vmem:[%s1542_s30 + $0xb18] sm:$0xff] }
  0xea   : > { %v494_v36 = vld [vmem:[%s1542_s30 + $0xb20] sm:$0xff]  ;;  %1004 = vst [vmem:[%s1551_s25 + $0xb10] sm:$0xff] %v492_v34  ;;  %1005 = vst [vmem:[%s1551_s25 + $0xb18] sm:$0xff] %v493_v35  ;;  %v495_v37 = vld [vmem:[%s1542_s30 + $0xb28] sm:$0xff] }
  0xeb   : > { %1006 = vst [vmem:[%s1551_s25 + $0xb20] sm:$0xff] %v494_v36  ;;  %v496_v38 = vld [vmem:[%s1542_s30 + $0xb30] sm:$0xff]  ;;  %v497_v39 = vld [vmem:[%s1542_s30 + $0xb38] sm:$0xff]  ;;  %1007 = vst [vmem:[%s1551_s25 + $0xb28] sm:$0xff] %v495_v37 }
  0xec   : > { %1008 = vst [vmem:[%s1551_s25 + $0xb30] sm:$0xff] %v496_v38  ;;  %1009 = vst [vmem:[%s1551_s25 + $0xb38] sm:$0xff] %v497_v39  ;;  %v498_v40 = vld [vmem:[%s1542_s30 + $0xb40] sm:$0xff]  ;;  %v499_v41 = vld [vmem:[%s1542_s30 + $0xb48] sm:$0xff] }
  0xed   : > { %v500_v42 = vld [vmem:[%s1542_s30 + $0xb50] sm:$0xff]  ;;  %1010 = vst [vmem:[%s1551_s25 + $0xb40] sm:$0xff] %v498_v40  ;;  %1011 = vst [vmem:[%s1551_s25 + $0xb48] sm:$0xff] %v499_v41  ;;  %v501_v43 = vld [vmem:[%s1542_s30 + $0xb58] sm:$0xff] }
  0xee   : > { %1012 = vst [vmem:[%s1551_s25 + $0xb50] sm:$0xff] %v500_v42  ;;  %v502_v44 = vld [vmem:[%s1542_s30 + $0xb60] sm:$0xff]  ;;  %v503_v45 = vld [vmem:[%s1542_s30 + $0xb68] sm:$0xff]  ;;  %1013 = vst [vmem:[%s1551_s25 + $0xb58] sm:$0xff] %v501_v43 }
  0xef   : > { %1014 = vst [vmem:[%s1551_s25 + $0xb60] sm:$0xff] %v502_v44  ;;  %1015 = vst [vmem:[%s1551_s25 + $0xb68] sm:$0xff] %v503_v45  ;;  %v504_v46 = vld [vmem:[%s1542_s30 + $0xb70] sm:$0xff]  ;;  %v505_v47 = vld [vmem:[%s1542_s30 + $0xb78] sm:$0xff] }
  0xf0   : > { %v506_v48 = vld [vmem:[%s1542_s30 + $0xb80] sm:$0xff]  ;;  %1016 = vst [vmem:[%s1551_s25 + $0xb70] sm:$0xff] %v504_v46  ;;  %1017 = vst [vmem:[%s1551_s25 + $0xb78] sm:$0xff] %v505_v47  ;;  %v507_v49 = vld [vmem:[%s1542_s30 + $0xb88] sm:$0xff] }
  0xf1   : > { %1018 = vst [vmem:[%s1551_s25 + $0xb80] sm:$0xff] %v506_v48  ;;  %v508_v50 = vld [vmem:[%s1542_s30 + $0xb90] sm:$0xff]  ;;  %v509_v51 = vld [vmem:[%s1542_s30 + $0xb98] sm:$0xff]  ;;  %1019 = vst [vmem:[%s1551_s25 + $0xb88] sm:$0xff] %v507_v49 }
  0xf2   : > { %1020 = vst [vmem:[%s1551_s25 + $0xb90] sm:$0xff] %v508_v50  ;;  %1021 = vst [vmem:[%s1551_s25 + $0xb98] sm:$0xff] %v509_v51  ;;  %v510_v52 = vld [vmem:[%s1542_s30 + $0xba0] sm:$0xff]  ;;  %v511_v53 = vld [vmem:[%s1542_s30 + $0xba8] sm:$0xff] }
  0xf3   : > { %v512_v54 = vld [vmem:[%s1542_s30 + $0xbb0] sm:$0xff]  ;;  %1022 = vst [vmem:[%s1551_s25 + $0xba0] sm:$0xff] %v510_v52  ;;  %1023 = vst [vmem:[%s1551_s25 + $0xba8] sm:$0xff] %v511_v53  ;;  %v513_v55 = vld [vmem:[%s1542_s30 + $0xbb8] sm:$0xff] }
  0xf4   : > { %1024 = vst [vmem:[%s1551_s25 + $0xbb0] sm:$0xff] %v512_v54  ;;  %v514_v56 = vld [vmem:[%s1542_s30 + $0xbc0] sm:$0xff]  ;;  %v515_v57 = vld [vmem:[%s1542_s30 + $0xbc8] sm:$0xff]  ;;  %1025 = vst [vmem:[%s1551_s25 + $0xbb8] sm:$0xff] %v513_v55 }
  0xf5   : > { %1026 = vst [vmem:[%s1551_s25 + $0xbc0] sm:$0xff] %v514_v56  ;;  %1027 = vst [vmem:[%s1551_s25 + $0xbc8] sm:$0xff] %v515_v57  ;;  %v516_v58 = vld [vmem:[%s1542_s30 + $0xbd0] sm:$0xff]  ;;  %v517_v59 = vld [vmem:[%s1542_s30 + $0xbd8] sm:$0xff] }
  0xf6   : > { %v518_v60 = vld [vmem:[%s1542_s30 + $0xbe0] sm:$0xff]  ;;  %1028 = vst [vmem:[%s1551_s25 + $0xbd0] sm:$0xff] %v516_v58  ;;  %1029 = vst [vmem:[%s1551_s25 + $0xbd8] sm:$0xff] %v517_v59  ;;  %v519_v61 = vld [vmem:[%s1542_s30 + $0xbe8] sm:$0xff] }
  0xf7   : > { %1030 = vst [vmem:[%s1551_s25 + $0xbe0] sm:$0xff] %v518_v60  ;;  %v520_v62 = vld [vmem:[%s1542_s30 + $0xbf0] sm:$0xff]  ;;  %v521_v63 = vld [vmem:[%s1542_s30 + $0xbf8] sm:$0xff]  ;;  %1031 = vst [vmem:[%s1551_s25 + $0xbe8] sm:$0xff] %v519_v61 }
  0xf8   : > { %1032 = vst [vmem:[%s1551_s25 + $0xbf0] sm:$0xff] %v520_v62  ;;  %1033 = vst [vmem:[%s1551_s25 + $0xbf8] sm:$0xff] %v521_v63  ;;  %v522_v0 = vld [vmem:[%s1542_s30 + $0xc00] sm:$0xff]  ;;  %v523_v1 = vld [vmem:[%s1542_s30 + $0xc08] sm:$0xff] }
  0xf9   : > { %v524_v2 = vld [vmem:[%s1542_s30 + $0xc10] sm:$0xff]  ;;  %1034 = vst [vmem:[%s1551_s25 + $0xc00] sm:$0xff] %v522_v0  ;;  %1035 = vst [vmem:[%s1551_s25 + $0xc08] sm:$0xff] %v523_v1  ;;  %v525_v3 = vld [vmem:[%s1542_s30 + $0xc18] sm:$0xff] }
  0xfa   : > { %1036 = vst [vmem:[%s1551_s25 + $0xc10] sm:$0xff] %v524_v2  ;;  %v526_v4 = vld [vmem:[%s1542_s30 + $0xc20] sm:$0xff]  ;;  %v527_v5 = vld [vmem:[%s1542_s30 + $0xc28] sm:$0xff]  ;;  %1037 = vst [vmem:[%s1551_s25 + $0xc18] sm:$0xff] %v525_v3 }
  0xfb   : > { %1038 = vst [vmem:[%s1551_s25 + $0xc20] sm:$0xff] %v526_v4  ;;  %1039 = vst [vmem:[%s1551_s25 + $0xc28] sm:$0xff] %v527_v5  ;;  %v528_v6 = vld [vmem:[%s1542_s30 + $0xc30] sm:$0xff]  ;;  %v529_v7 = vld [vmem:[%s1542_s30 + $0xc38] sm:$0xff] }
  0xfc   : > { %v530_v8 = vld [vmem:[%s1542_s30 + $0xc40] sm:$0xff]  ;;  %1040 = vst [vmem:[%s1551_s25 + $0xc30] sm:$0xff] %v528_v6  ;;  %1041 = vst [vmem:[%s1551_s25 + $0xc38] sm:$0xff] %v529_v7  ;;  %v531_v9 = vld [vmem:[%s1542_s30 + $0xc48] sm:$0xff] }
  0xfd   : > { %1042 = vst [vmem:[%s1551_s25 + $0xc40] sm:$0xff] %v530_v8  ;;  %v532_v10 = vld [vmem:[%s1542_s30 + $0xc50] sm:$0xff]  ;;  %v533_v11 = vld [vmem:[%s1542_s30 + $0xc58] sm:$0xff]  ;;  %1043 = vst [vmem:[%s1551_s25 + $0xc48] sm:$0xff] %v531_v9 }
  0xfe   : > { %1044 = vst [vmem:[%s1551_s25 + $0xc50] sm:$0xff] %v532_v10  ;;  %1045 = vst [vmem:[%s1551_s25 + $0xc58] sm:$0xff] %v533_v11  ;;  %v534_v12 = vld [vmem:[%s1542_s30 + $0xc60] sm:$0xff]  ;;  %v535_v13 = vld [vmem:[%s1542_s30 + $0xc68] sm:$0xff] }
  0xff   : > { %v536_v14 = vld [vmem:[%s1542_s30 + $0xc70] sm:$0xff]  ;;  %1046 = vst [vmem:[%s1551_s25 + $0xc60] sm:$0xff] %v534_v12  ;;  %1047 = vst [vmem:[%s1551_s25 + $0xc68] sm:$0xff] %v535_v13  ;;  %v537_v15 = vld [vmem:[%s1542_s30 + $0xc78] sm:$0xff] }
 0x100   : > { %1048 = vst [vmem:[%s1551_s25 + $0xc70] sm:$0xff] %v536_v14  ;;  %v538_v16 = vld [vmem:[%s1542_s30 + $0xc80] sm:$0xff]  ;;  %v539_v17 = vld [vmem:[%s1542_s30 + $0xc88] sm:$0xff]  ;;  %1049 = vst [vmem:[%s1551_s25 + $0xc78] sm:$0xff] %v537_v15 }
 0x101   : > { %1050 = vst [vmem:[%s1551_s25 + $0xc80] sm:$0xff] %v538_v16  ;;  %1051 = vst [vmem:[%s1551_s25 + $0xc88] sm:$0xff] %v539_v17  ;;  %v540_v18 = vld [vmem:[%s1542_s30 + $0xc90] sm:$0xff]  ;;  %v541_v19 = vld [vmem:[%s1542_s30 + $0xc98] sm:$0xff] }
 0x102   : > { %v542_v20 = vld [vmem:[%s1542_s30 + $0xca0] sm:$0xff]  ;;  %1052 = vst [vmem:[%s1551_s25 + $0xc90] sm:$0xff] %v540_v18  ;;  %1053 = vst [vmem:[%s1551_s25 + $0xc98] sm:$0xff] %v541_v19  ;;  %v543_v21 = vld [vmem:[%s1542_s30 + $0xca8] sm:$0xff] }
 0x103   : > { %1054 = vst [vmem:[%s1551_s25 + $0xca0] sm:$0xff] %v542_v20  ;;  %v544_v22 = vld [vmem:[%s1542_s30 + $0xcb0] sm:$0xff]  ;;  %v545_v23 = vld [vmem:[%s1542_s30 + $0xcb8] sm:$0xff]  ;;  %1055 = vst [vmem:[%s1551_s25 + $0xca8] sm:$0xff] %v543_v21 }
 0x104   : > { %1056 = vst [vmem:[%s1551_s25 + $0xcb0] sm:$0xff] %v544_v22  ;;  %1057 = vst [vmem:[%s1551_s25 + $0xcb8] sm:$0xff] %v545_v23  ;;  %v546_v24 = vld [vmem:[%s1542_s30 + $0xcc0] sm:$0xff]  ;;  %v547_v25 = vld [vmem:[%s1542_s30 + $0xcc8] sm:$0xff] }
 0x105   : > { %v548_v26 = vld [vmem:[%s1542_s30 + $0xcd0] sm:$0xff]  ;;  %1058 = vst [vmem:[%s1551_s25 + $0xcc0] sm:$0xff] %v546_v24  ;;  %1059 = vst [vmem:[%s1551_s25 + $0xcc8] sm:$0xff] %v547_v25  ;;  %v549_v27 = vld [vmem:[%s1542_s30 + $0xcd8] sm:$0xff] }
 0x106   : > { %1060 = vst [vmem:[%s1551_s25 + $0xcd0] sm:$0xff] %v548_v26  ;;  %v550_v28 = vld [vmem:[%s1542_s30 + $0xce0] sm:$0xff]  ;;  %v551_v29 = vld [vmem:[%s1542_s30 + $0xce8] sm:$0xff]  ;;  %1061 = vst [vmem:[%s1551_s25 + $0xcd8] sm:$0xff] %v549_v27 }
 0x107   : > { %1062 = vst [vmem:[%s1551_s25 + $0xce0] sm:$0xff] %v550_v28  ;;  %1063 = vst [vmem:[%s1551_s25 + $0xce8] sm:$0xff] %v551_v29  ;;  %v552_v30 = vld [vmem:[%s1542_s30 + $0xcf0] sm:$0xff]  ;;  %v553_v31 = vld [vmem:[%s1542_s30 + $0xcf8] sm:$0xff] }
 0x108   : > { %v554_v32 = vld [vmem:[%s1542_s30 + $0xd00] sm:$0xff]  ;;  %1064 = vst [vmem:[%s1551_s25 + $0xcf0] sm:$0xff] %v552_v30  ;;  %1065 = vst [vmem:[%s1551_s25 + $0xcf8] sm:$0xff] %v553_v31  ;;  %v555_v33 = vld [vmem:[%s1542_s30 + $0xd08] sm:$0xff] }
 0x109   : > { %1066 = vst [vmem:[%s1551_s25 + $0xd00] sm:$0xff] %v554_v32  ;;  %v556_v34 = vld [vmem:[%s1542_s30 + $0xd10] sm:$0xff]  ;;  %v557_v35 = vld [vmem:[%s1542_s30 + $0xd18] sm:$0xff]  ;;  %1067 = vst [vmem:[%s1551_s25 + $0xd08] sm:$0xff] %v555_v33 }
 0x10a   : > { %1068 = vst [vmem:[%s1551_s25 + $0xd10] sm:$0xff] %v556_v34  ;;  %1069 = vst [vmem:[%s1551_s25 + $0xd18] sm:$0xff] %v557_v35  ;;  %v558_v36 = vld [vmem:[%s1542_s30 + $0xd20] sm:$0xff]  ;;  %v559_v37 = vld [vmem:[%s1542_s30 + $0xd28] sm:$0xff] }
 0x10b   : > { %v560_v38 = vld [vmem:[%s1542_s30 + $0xd30] sm:$0xff]  ;;  %1070 = vst [vmem:[%s1551_s25 + $0xd20] sm:$0xff] %v558_v36  ;;  %1071 = vst [vmem:[%s1551_s25 + $0xd28] sm:$0xff] %v559_v37  ;;  %v561_v39 = vld [vmem:[%s1542_s30 + $0xd38] sm:$0xff] }
 0x10c   : > { %1072 = vst [vmem:[%s1551_s25 + $0xd30] sm:$0xff] %v560_v38  ;;  %v562_v40 = vld [vmem:[%s1542_s30 + $0xd40] sm:$0xff]  ;;  %v563_v41 = vld [vmem:[%s1542_s30 + $0xd48] sm:$0xff]  ;;  %1073 = vst [vmem:[%s1551_s25 + $0xd38] sm:$0xff] %v561_v39 }
 0x10d   : > { %1074 = vst [vmem:[%s1551_s25 + $0xd40] sm:$0xff] %v562_v40  ;;  %1075 = vst [vmem:[%s1551_s25 + $0xd48] sm:$0xff] %v563_v41  ;;  %v564_v42 = vld [vmem:[%s1542_s30 + $0xd50] sm:$0xff]  ;;  %v565_v43 = vld [vmem:[%s1542_s30 + $0xd58] sm:$0xff] }
 0x10e   : > { %v566_v44 = vld [vmem:[%s1542_s30 + $0xd60] sm:$0xff]  ;;  %1076 = vst [vmem:[%s1551_s25 + $0xd50] sm:$0xff] %v564_v42  ;;  %1077 = vst [vmem:[%s1551_s25 + $0xd58] sm:$0xff] %v565_v43  ;;  %v567_v45 = vld [vmem:[%s1542_s30 + $0xd68] sm:$0xff] }
 0x10f   : > { %1078 = vst [vmem:[%s1551_s25 + $0xd60] sm:$0xff] %v566_v44  ;;  %v568_v46 = vld [vmem:[%s1542_s30 + $0xd70] sm:$0xff]  ;;  %v569_v47 = vld [vmem:[%s1542_s30 + $0xd78] sm:$0xff]  ;;  %1079 = vst [vmem:[%s1551_s25 + $0xd68] sm:$0xff] %v567_v45 }
 0x110   : > { %1080 = vst [vmem:[%s1551_s25 + $0xd70] sm:$0xff] %v568_v46  ;;  %1081 = vst [vmem:[%s1551_s25 + $0xd78] sm:$0xff] %v569_v47  ;;  %v570_v48 = vld [vmem:[%s1542_s30 + $0xd80] sm:$0xff]  ;;  %v571_v49 = vld [vmem:[%s1542_s30 + $0xd88] sm:$0xff] }
 0x111   : > { %v572_v50 = vld [vmem:[%s1542_s30 + $0xd90] sm:$0xff]  ;;  %1082 = vst [vmem:[%s1551_s25 + $0xd80] sm:$0xff] %v570_v48  ;;  %1083 = vst [vmem:[%s1551_s25 + $0xd88] sm:$0xff] %v571_v49  ;;  %v573_v51 = vld [vmem:[%s1542_s30 + $0xd98] sm:$0xff] }
 0x112   : > { %1084 = vst [vmem:[%s1551_s25 + $0xd90] sm:$0xff] %v572_v50  ;;  %v574_v52 = vld [vmem:[%s1542_s30 + $0xda0] sm:$0xff]  ;;  %v575_v53 = vld [vmem:[%s1542_s30 + $0xda8] sm:$0xff]  ;;  %1085 = vst [vmem:[%s1551_s25 + $0xd98] sm:$0xff] %v573_v51 }
 0x113   : > { %1086 = vst [vmem:[%s1551_s25 + $0xda0] sm:$0xff] %v574_v52  ;;  %1087 = vst [vmem:[%s1551_s25 + $0xda8] sm:$0xff] %v575_v53  ;;  %v576_v54 = vld [vmem:[%s1542_s30 + $0xdb0] sm:$0xff]  ;;  %v577_v55 = vld [vmem:[%s1542_s30 + $0xdb8] sm:$0xff] }
 0x114   : > { %v578_v56 = vld [vmem:[%s1542_s30 + $0xdc0] sm:$0xff]  ;;  %1088 = vst [vmem:[%s1551_s25 + $0xdb0] sm:$0xff] %v576_v54  ;;  %1089 = vst [vmem:[%s1551_s25 + $0xdb8] sm:$0xff] %v577_v55  ;;  %v579_v57 = vld [vmem:[%s1542_s30 + $0xdc8] sm:$0xff] }
 0x115   : > { %1090 = vst [vmem:[%s1551_s25 + $0xdc0] sm:$0xff] %v578_v56  ;;  %v580_v58 = vld [vmem:[%s1542_s30 + $0xdd0] sm:$0xff]  ;;  %v581_v59 = vld [vmem:[%s1542_s30 + $0xdd8] sm:$0xff]  ;;  %1091 = vst [vmem:[%s1551_s25 + $0xdc8] sm:$0xff] %v579_v57 }
 0x116   : > { %1092 = vst [vmem:[%s1551_s25 + $0xdd0] sm:$0xff] %v580_v58  ;;  %1093 = vst [vmem:[%s1551_s25 + $0xdd8] sm:$0xff] %v581_v59  ;;  %v582_v60 = vld [vmem:[%s1542_s30 + $0xde0] sm:$0xff]  ;;  %v583_v61 = vld [vmem:[%s1542_s30 + $0xde8] sm:$0xff] }
 0x117   : > { %v584_v62 = vld [vmem:[%s1542_s30 + $0xdf0] sm:$0xff]  ;;  %1094 = vst [vmem:[%s1551_s25 + $0xde0] sm:$0xff] %v582_v60  ;;  %1095 = vst [vmem:[%s1551_s25 + $0xde8] sm:$0xff] %v583_v61  ;;  %v585_v63 = vld [vmem:[%s1542_s30 + $0xdf8] sm:$0xff] }
 0x118   : > { %1096 = vst [vmem:[%s1551_s25 + $0xdf0] sm:$0xff] %v584_v62  ;;  %v586_v0 = vld [vmem:[%s1542_s30 + $0xe00] sm:$0xff]  ;;  %v587_v1 = vld [vmem:[%s1542_s30 + $0xe08] sm:$0xff]  ;;  %1097 = vst [vmem:[%s1551_s25 + $0xdf8] sm:$0xff] %v585_v63 }
 0x119   : > { %1098 = vst [vmem:[%s1551_s25 + $0xe00] sm:$0xff] %v586_v0  ;;  %1099 = vst [vmem:[%s1551_s25 + $0xe08] sm:$0xff] %v587_v1  ;;  %v588_v2 = vld [vmem:[%s1542_s30 + $0xe10] sm:$0xff]  ;;  %v589_v3 = vld [vmem:[%s1542_s30 + $0xe18] sm:$0xff] }
 0x11a   : > { %v590_v4 = vld [vmem:[%s1542_s30 + $0xe20] sm:$0xff]  ;;  %1100 = vst [vmem:[%s1551_s25 + $0xe10] sm:$0xff] %v588_v2  ;;  %1101 = vst [vmem:[%s1551_s25 + $0xe18] sm:$0xff] %v589_v3  ;;  %v591_v5 = vld [vmem:[%s1542_s30 + $0xe28] sm:$0xff] }
 0x11b   : > { %1102 = vst [vmem:[%s1551_s25 + $0xe20] sm:$0xff] %v590_v4  ;;  %v592_v6 = vld [vmem:[%s1542_s30 + $0xe30] sm:$0xff]  ;;  %v593_v7 = vld [vmem:[%s1542_s30 + $0xe38] sm:$0xff]  ;;  %1103 = vst [vmem:[%s1551_s25 + $0xe28] sm:$0xff] %v591_v5 }
 0x11c   : > { %1104 = vst [vmem:[%s1551_s25 + $0xe30] sm:$0xff] %v592_v6  ;;  %1105 = vst [vmem:[%s1551_s25 + $0xe38] sm:$0xff] %v593_v7  ;;  %v594_v8 = vld [vmem:[%s1542_s30 + $0xe40] sm:$0xff]  ;;  %v595_v9 = vld [vmem:[%s1542_s30 + $0xe48] sm:$0xff] }
 0x11d   : > { %v596_v10 = vld [vmem:[%s1542_s30 + $0xe50] sm:$0xff]  ;;  %1106 = vst [vmem:[%s1551_s25 + $0xe40] sm:$0xff] %v594_v8  ;;  %1107 = vst [vmem:[%s1551_s25 + $0xe48] sm:$0xff] %v595_v9  ;;  %v597_v11 = vld [vmem:[%s1542_s30 + $0xe58] sm:$0xff] }
 0x11e   : > { %1108 = vst [vmem:[%s1551_s25 + $0xe50] sm:$0xff] %v596_v10  ;;  %v598_v12 = vld [vmem:[%s1542_s30 + $0xe60] sm:$0xff]  ;;  %v599_v13 = vld [vmem:[%s1542_s30 + $0xe68] sm:$0xff]  ;;  %1109 = vst [vmem:[%s1551_s25 + $0xe58] sm:$0xff] %v597_v11 }
 0x11f   : > { %1110 = vst [vmem:[%s1551_s25 + $0xe60] sm:$0xff] %v598_v12  ;;  %1111 = vst [vmem:[%s1551_s25 + $0xe68] sm:$0xff] %v599_v13  ;;  %v600_v14 = vld [vmem:[%s1542_s30 + $0xe70] sm:$0xff]  ;;  %v601_v15 = vld [vmem:[%s1542_s30 + $0xe78] sm:$0xff] }
 0x120   : > { %v602_v16 = vld [vmem:[%s1542_s30 + $0xe80] sm:$0xff]  ;;  %1112 = vst [vmem:[%s1551_s25 + $0xe70] sm:$0xff] %v600_v14  ;;  %1113 = vst [vmem:[%s1551_s25 + $0xe78] sm:$0xff] %v601_v15  ;;  %v603_v17 = vld [vmem:[%s1542_s30 + $0xe88] sm:$0xff] }
 0x121   : > { %1114 = vst [vmem:[%s1551_s25 + $0xe80] sm:$0xff] %v602_v16  ;;  %v604_v18 = vld [vmem:[%s1542_s30 + $0xe90] sm:$0xff]  ;;  %v605_v19 = vld [vmem:[%s1542_s30 + $0xe98] sm:$0xff]  ;;  %1115 = vst [vmem:[%s1551_s25 + $0xe88] sm:$0xff] %v603_v17 }
 0x122   : > { %1116 = vst [vmem:[%s1551_s25 + $0xe90] sm:$0xff] %v604_v18  ;;  %1117 = vst [vmem:[%s1551_s25 + $0xe98] sm:$0xff] %v605_v19  ;;  %v606_v20 = vld [vmem:[%s1542_s30 + $0xea0] sm:$0xff]  ;;  %v607_v21 = vld [vmem:[%s1542_s30 + $0xea8] sm:$0xff] }
 0x123   : > { %v608_v22 = vld [vmem:[%s1542_s30 + $0xeb0] sm:$0xff]  ;;  %1118 = vst [vmem:[%s1551_s25 + $0xea0] sm:$0xff] %v606_v20  ;;  %1119 = vst [vmem:[%s1551_s25 + $0xea8] sm:$0xff] %v607_v21  ;;  %v609_v23 = vld [vmem:[%s1542_s30 + $0xeb8] sm:$0xff] }
 0x124   : > { %1120 = vst [vmem:[%s1551_s25 + $0xeb0] sm:$0xff] %v608_v22  ;;  %v610_v24 = vld [vmem:[%s1542_s30 + $0xec0] sm:$0xff]  ;;  %v611_v25 = vld [vmem:[%s1542_s30 + $0xec8] sm:$0xff]  ;;  %1121 = vst [vmem:[%s1551_s25 + $0xeb8] sm:$0xff] %v609_v23 }
 0x125   : > { %1122 = vst [vmem:[%s1551_s25 + $0xec0] sm:$0xff] %v610_v24  ;;  %1123 = vst [vmem:[%s1551_s25 + $0xec8] sm:$0xff] %v611_v25  ;;  %v612_v26 = vld [vmem:[%s1542_s30 + $0xed0] sm:$0xff]  ;;  %v613_v27 = vld [vmem:[%s1542_s30 + $0xed8] sm:$0xff] }
 0x126   : > { %v614_v28 = vld [vmem:[%s1542_s30 + $0xee0] sm:$0xff]  ;;  %1124 = vst [vmem:[%s1551_s25 + $0xed0] sm:$0xff] %v612_v26  ;;  %1125 = vst [vmem:[%s1551_s25 + $0xed8] sm:$0xff] %v613_v27  ;;  %v615_v29 = vld [vmem:[%s1542_s30 + $0xee8] sm:$0xff] }
 0x127   : > { %1126 = vst [vmem:[%s1551_s25 + $0xee0] sm:$0xff] %v614_v28  ;;  %v616_v30 = vld [vmem:[%s1542_s30 + $0xef0] sm:$0xff]  ;;  %v617_v31 = vld [vmem:[%s1542_s30 + $0xef8] sm:$0xff]  ;;  %1127 = vst [vmem:[%s1551_s25 + $0xee8] sm:$0xff] %v615_v29 }
 0x128   : > { %1128 = vst [vmem:[%s1551_s25 + $0xef0] sm:$0xff] %v616_v30  ;;  %1129 = vst [vmem:[%s1551_s25 + $0xef8] sm:$0xff] %v617_v31  ;;  %v618_v32 = vld [vmem:[%s1542_s30 + $0xf00] sm:$0xff]  ;;  %v619_v33 = vld [vmem:[%s1542_s30 + $0xf08] sm:$0xff] }
 0x129   : > { %v620_v34 = vld [vmem:[%s1542_s30 + $0xf10] sm:$0xff]  ;;  %1130 = vst [vmem:[%s1551_s25 + $0xf00] sm:$0xff] %v618_v32  ;;  %1131 = vst [vmem:[%s1551_s25 + $0xf08] sm:$0xff] %v619_v33  ;;  %v621_v35 = vld [vmem:[%s1542_s30 + $0xf18] sm:$0xff] }
 0x12a   : > { %1132 = vst [vmem:[%s1551_s25 + $0xf10] sm:$0xff] %v620_v34  ;;  %v622_v36 = vld [vmem:[%s1542_s30 + $0xf20] sm:$0xff]  ;;  %v623_v37 = vld [vmem:[%s1542_s30 + $0xf28] sm:$0xff]  ;;  %1133 = vst [vmem:[%s1551_s25 + $0xf18] sm:$0xff] %v621_v35 }
 0x12b   : > { %1134 = vst [vmem:[%s1551_s25 + $0xf20] sm:$0xff] %v622_v36  ;;  %1135 = vst [vmem:[%s1551_s25 + $0xf28] sm:$0xff] %v623_v37  ;;  %v624_v38 = vld [vmem:[%s1542_s30 + $0xf30] sm:$0xff]  ;;  %v625_v39 = vld [vmem:[%s1542_s30 + $0xf38] sm:$0xff] }
 0x12c   : > { %v626_v40 = vld [vmem:[%s1542_s30 + $0xf40] sm:$0xff]  ;;  %1136 = vst [vmem:[%s1551_s25 + $0xf30] sm:$0xff] %v624_v38  ;;  %1137 = vst [vmem:[%s1551_s25 + $0xf38] sm:$0xff] %v625_v39  ;;  %v627_v41 = vld [vmem:[%s1542_s30 + $0xf48] sm:$0xff] }
 0x12d   : > { %1138 = vst [vmem:[%s1551_s25 + $0xf40] sm:$0xff] %v626_v40  ;;  %v628_v42 = vld [vmem:[%s1542_s30 + $0xf50] sm:$0xff]  ;;  %v629_v43 = vld [vmem:[%s1542_s30 + $0xf58] sm:$0xff]  ;;  %1139 = vst [vmem:[%s1551_s25 + $0xf48] sm:$0xff] %v627_v41 }
 0x12e   : > { %1140 = vst [vmem:[%s1551_s25 + $0xf50] sm:$0xff] %v628_v42  ;;  %1141 = vst [vmem:[%s1551_s25 + $0xf58] sm:$0xff] %v629_v43  ;;  %v630_v44 = vld [vmem:[%s1542_s30 + $0xf60] sm:$0xff]  ;;  %v631_v45 = vld [vmem:[%s1542_s30 + $0xf68] sm:$0xff] }
 0x12f   : > { %v632_v46 = vld [vmem:[%s1542_s30 + $0xf70] sm:$0xff]  ;;  %1142 = vst [vmem:[%s1551_s25 + $0xf60] sm:$0xff] %v630_v44  ;;  %1143 = vst [vmem:[%s1551_s25 + $0xf68] sm:$0xff] %v631_v45  ;;  %v633_v47 = vld [vmem:[%s1542_s30 + $0xf78] sm:$0xff] }
 0x130   : > { %1144 = vst [vmem:[%s1551_s25 + $0xf70] sm:$0xff] %v632_v46  ;;  %v634_v48 = vld [vmem:[%s1542_s30 + $0xf80] sm:$0xff]  ;;  %v635_v49 = vld [vmem:[%s1542_s30 + $0xf88] sm:$0xff]  ;;  %1145 = vst [vmem:[%s1551_s25 + $0xf78] sm:$0xff] %v633_v47 }
 0x131   : > { %1146 = vst [vmem:[%s1551_s25 + $0xf80] sm:$0xff] %v634_v48  ;;  %1147 = vst [vmem:[%s1551_s25 + $0xf88] sm:$0xff] %v635_v49  ;;  %v636_v50 = vld [vmem:[%s1542_s30 + $0xf90] sm:$0xff]  ;;  %v637_v51 = vld [vmem:[%s1542_s30 + $0xf98] sm:$0xff] }
 0x132   : > { %v638_v52 = vld [vmem:[%s1542_s30 + $0xfa0] sm:$0xff]  ;;  %1148 = vst [vmem:[%s1551_s25 + $0xf90] sm:$0xff] %v636_v50  ;;  %1149 = vst [vmem:[%s1551_s25 + $0xf98] sm:$0xff] %v637_v51  ;;  %v639_v53 = vld [vmem:[%s1542_s30 + $0xfa8] sm:$0xff] }
 0x133   : > { %1150 = vst [vmem:[%s1551_s25 + $0xfa0] sm:$0xff] %v638_v52  ;;  %v640_v54 = vld [vmem:[%s1542_s30 + $0xfb0] sm:$0xff]  ;;  %v641_v55 = vld [vmem:[%s1542_s30 + $0xfb8] sm:$0xff]  ;;  %1151 = vst [vmem:[%s1551_s25 + $0xfa8] sm:$0xff] %v639_v53 }
 0x134   : > { %1152 = vst [vmem:[%s1551_s25 + $0xfb0] sm:$0xff] %v640_v54  ;;  %1153 = vst [vmem:[%s1551_s25 + $0xfb8] sm:$0xff] %v641_v55  ;;  %v642_v56 = vld [vmem:[%s1542_s30 + $0xfc0] sm:$0xff]  ;;  %v643_v57 = vld [vmem:[%s1542_s30 + $0xfc8] sm:$0xff] }
 0x135   : > { %v644_v58 = vld [vmem:[%s1542_s30 + $0xfd0] sm:$0xff]  ;;  %1154 = vst [vmem:[%s1551_s25 + $0xfc0] sm:$0xff] %v642_v56  ;;  %1155 = vst [vmem:[%s1551_s25 + $0xfc8] sm:$0xff] %v643_v57  ;;  %v645_v59 = vld [vmem:[%s1542_s30 + $0xfd8] sm:$0xff] }
 0x136   : > { %1156 = vst [vmem:[%s1551_s25 + $0xfd0] sm:$0xff] %v644_v58  ;;  %v646_v60 = vld [vmem:[%s1542_s30 + $0xfe0] sm:$0xff]  ;;  %v647_v61 = vld [vmem:[%s1542_s30 + $0xfe8] sm:$0xff]  ;;  %1157 = vst [vmem:[%s1551_s25 + $0xfd8] sm:$0xff] %v645_v59 }
 0x137   : > { %1158 = vst [vmem:[%s1551_s25 + $0xfe0] sm:$0xff] %v646_v60  ;;  %1159 = vst [vmem:[%s1551_s25 + $0xfe8] sm:$0xff] %v647_v61  ;;  %v648_v62 = vld [vmem:[%s1542_s30 + $0xff0] sm:$0xff]  ;;  %v649_v63 = vld [vmem:[%s1542_s30 + $0xff8] sm:$0xff] }
 0x138   : > { %1160 = vst [vmem:[%s1551_s25 + $0xff0] sm:$0xff] %v648_v62  ;;  %1161 = vst [vmem:[%s1551_s25 + $0xff8] sm:$0xff] %v649_v63 }
 0x139   : > { %1363 = shalt.err (!%p1360_p2)
}
 0x13a   : > { %s1364_s13 = scalar_lea.hbm %s2566_s29, 65536  ;;  %s1368_s20 = scalar_lea.hbm %s2626_s1, 131072 }
 0x13b   : > { %p1365_p4 = scmp.ne.s32.totalorder %s2566_s29, %s1364_s13  ;;  %p1369_p9 = scmp.lt.u32.totalorder %s2566_s29, %s2626_s1 }
 0x13c   : > { %p1370_p1 = scmp.lt.u32.totalorder %s1368_s20, %s1364_s13  ;;  %p1372_p6 = scmp.lt.u32.totalorder %s1364_s13, %s2566_s29 }
 0x13d   : > { %p1366_p5 = pnand %p1365_p4, %p2633_p11 }
 0x13e   : > { %p1371_p3 = por %p1370_p1, %p1369_p9 }
 0x13f   : > { %p1367_p7 = pneg %p1366_p5 }
 0x140   : > { %p1373_p12 = por %p1372_p6, %p1371_p3 }
 0x142   : > { %p1374_p13 = pnand %p1373_p12, %p1367_p7 }
 0x144   : > { %1377 = shalt.err (!%p1374_p13)
}
 0x145   : > { %s1422_s24 = smov 16384   ;;  %s1423_s26 = smov 1024  }
 0x146   : > { %1272 = dma.vmem_to_hbm [thread:$0]  (%p2633_p11), %s2568_s27, 65536, %s2566_s29, %s1163_s2, %s1422_s24, %s1422_s24, %s1423_s26  }
 0x147 PF: > { %s1192_s30 = sand.u32 1, %s1404_s6   ;;  %p2634_p8 = scmp.ne.s32.totalorder %s2631_s19, 0 }
 0x148   : > { %p2635_p10 = scmp.ge.s32.totalorder %s1416_s9, 2  ;;  %s1193_s25 = scalar_lea.sflag [#allocation4], %s1192_s30 }
 0x14a   : > { %p1279_p0 = pnand %p2635_p10, %p2634_p8 }
 0x14c   : > { %1399 = dma.done.wait (!%p1279_p0), %s1193_s25, 65536  }
 0x14d   : > { %1401 = vsyncadd (!%p1279_p0), %s1193_s25, 4294901760  ;;  %p14_p2 = scmp.ge.s32.totalorder %s1459_s12, 4   ;;  %s2636_s6 = smov %s1408_s7 }
 0x14e   : > { %s2637_s7 = smov %s1412_s8  ;;  %s2638_s8 = smov %s1471_s15 }
 0x14f   : > { %s2639_s9 = smov %s1459_s12  ;;  %16 = sbr.rel (!%p14_p2) target bundleno = 5 (0x5), region = 69 }
 0x156   :  { %1198 = vsyncpa [#allocation3], 1 }
 0x157   :  { %1200 = vsyncpa [#allocation3 + $0x1], 1 }
 0x158   :  { %1201 = vsyncpa [#allocation4], 1 }
 0x159   :  { %1203 = vsyncpa [#allocation4 + $0x1], 1 }

</bundles_post_ra>
